<compile_context>
chip_gen: v7x
topology: tpu7x:2x2x1
jax: 0.10.0
libtpu: 0.0.40
codegen_flags: <defaults>
</compile_context>

<pallas_src>
import functools
import math

import numpy as np
import jax
import jax.numpy as jnp
from jax.experimental import pallas as pl
from jax.experimental.pallas import tpu as pltpu

LN_EPS = 1e-5       # LayerNorm eps
NORM_EPS = 1e-12    # F.normalize eps
NEG_BIG = -1e30     # additive mask for off-head attention entries


# ----------------------------------------------------------------------------
# Host-side (trace-time) constant helpers
# ----------------------------------------------------------------------------
def _tap_masks(H, W):
    """(9, H*W) validity masks for the 9 taps of a 3x3 conv with zero padding."""
    hw = H * W
    row = np.arange(hw) // W
    col = np.arange(hw) % W
    ms = []
    for di in (-1, 0, 1):
        for dj in (-1, 0, 1):
            ms.append(((row + di >= 0) & (row + di < H) &
                       (col + dj >= 0) & (col + dj < W)).astype(np.float32))
    return jnp.asarray(np.stack(ms))


def _head_bias(dim, num_heads):
    """(dim, dim) additive mask: 0 within a head's block, -1e30 off-block."""
    hd = dim // num_heads
    h = np.arange(dim) // hd
    return jnp.asarray(np.where(h[:, None] == h[None, :], 0.0, NEG_BIG)
                       .astype(np.float32))


# ----------------------------------------------------------------------------
# Fused TransformerBlock kernel (one grid step == one batch item)
# ----------------------------------------------------------------------------
def _block_kernel(x_ref, masks_ref, bias_ref, ln1w_ref, ln1b_ref, temp_ref,
                  w_qkv_ref, w_qkv_dw_ref, w_proj_ref,
                  ln2w_ref, ln2b_ref, w_in_ref, w_ffn_dw_ref, w_out_ref,
                  o_ref, *, H, W, hidden):
    HW = H * W
    x = x_ref[0]                               # (C, HW) f32, lane-dense
    C = x.shape[0]
    masks = masks_ref[...]                     # (9, HW) boundary masks

    def layer_norm(t, w, b):                   # WithBias LN over channels
        mu = jnp.mean(t, axis=0, keepdims=True)
        tc = t - mu
        var = jnp.mean(tc * tc, axis=0, keepdims=True)        # unbiased=False
        return tc * jax.lax.rsqrt(var + LN_EPS) * w + b

    def dwconv3x3(t, w9):                      # depthwise 3x3, stride 1, pad 1
        acc = jnp.zeros_like(t)
        k = 0
        for di in (-1, 0, 1):
            for dj in (-1, 0, 1):
                s = di * W + dj                # flat-index shift of this tap
                ts = t if s == 0 else pltpu.roll(t, (-s) % HW, axis=1)
                acc = acc + (ts * masks[k:k + 1, :]) * w9[:, k:k + 1]
                k += 1
        return acc

    # ----------- attention branch: x + proj(attn(dw(qkv(LN1(x))))) ----------
    xn = layer_norm(x, ln1w_ref[...], ln1b_ref[...])
    qkv = jnp.dot(w_qkv_ref[...], xn, preferred_element_type=jnp.float32)  # (3C, HW)
    qkv = dwconv3x3(qkv, w_qkv_dw_ref[...])
    q = qkv[0:C]
    k_ = qkv[C:2 * C]
    v = qkv[2 * C:3 * C]

    # F.normalize along the spatial axis; fold per-head temperature into q.
    qn = q / jnp.maximum(jnp.sqrt(jnp.sum(q * q, axis=1, keepdims=True)), NORM_EPS)
    kn = k_ / jnp.maximum(jnp.sqrt(jnp.sum(k_ * k_, axis=1, keepdims=True)), NORM_EPS)
    qn = qn * temp_ref[...]                    # (C, 1) per-channel temperature

    # All heads batched: one (C, C) gram; off-head entries masked additively.
    s = jax.lax.dot_general(qn, kn, (((1,), (1,)), ((), ())),
                            preferred_element_type=jnp.float32)
    s = s + bias_ref[...]                      # block-diagonal head mask
    m = jnp.max(s, axis=1, keepdims=True)
    e = jnp.exp(s - m)
    l = jnp.sum(e, axis=1, keepdims=True)
    p = e * pl.reciprocal(l, approx=True)      # EUP reciprocal
    attn_out = jnp.dot(p, v, preferred_element_type=jnp.float32)          # (C, HW)
    x1 = x + jnp.dot(w_proj_ref[...], attn_out, preferred_element_type=jnp.float32)

    # ----------- FFN branch: x1 + Wout(gelu(y1) * y2) ------------------------
    xn2 = layer_norm(x1, ln2w_ref[...], ln2b_ref[...])
    y = jnp.dot(w_in_ref[...], xn2, preferred_element_type=jnp.float32)   # (2h, HW)
    y = dwconv3x3(y, w_ffn_dw_ref[...])
    y1 = y[0:hidden]                           # sublane-aligned chunk
    y2 = y[hidden:2 * hidden]
    g = 0.5 * y1 * (1.0 + jax.lax.erf(y1 * (1.0 / math.sqrt(2.0)))) * y2  # exact GELU
    o_ref[0] = (x1 + jnp.dot(w_out_ref[...], g,
                             preferred_element_type=jnp.float32)).astype(o_ref.dtype)


# ----------------------------------------------------------------------------
# Wrapper: one pallas_call for the whole block
# ----------------------------------------------------------------------------
def transformer_block(x, params, *, num_heads):
    b, dim, h, w = x.shape
    hw = h * w
    hidden = params["w_out"].shape[1]
    hd = dim // num_heads

    x_f = x.reshape(b, dim, hw)                # free reshape, no transpose
    masks = _tap_masks(h, w)
    bias = _head_bias(dim, num_heads)
    ln1w = params["ln1_w"].reshape(dim, 1)
    ln1b = params["ln1_b"].reshape(dim, 1)
    ln2w = params["ln2_w"].reshape(dim, 1)
    ln2b = params["ln2_b"].reshape(dim, 1)
    temp = jnp.repeat(params["temperature"], hd).reshape(dim, 1)

    kern = functools.partial(_block_kernel, H=h, W=w, hidden=hidden)

    def full(a):                               # whole-array resident operand
        nd = a.ndim
        return pl.BlockSpec(a.shape, lambda i, _n=nd: (0,) * _n)

    operands = (x_f, masks, bias, ln1w, ln1b, temp,
                params["w_qkv"], params["w_qkv_dw"], params["w_proj"],
                ln2w, ln2b, params["w_in"], params["w_ffn_dw"], params["w_out"])

    out = pl.pallas_call(
        kern,
        out_shape=jax.ShapeDtypeStruct((b, dim, hw), x.dtype),
        grid=(b,),
        in_specs=[pl.BlockSpec((1, dim, hw), lambda i: (i, 0, 0))]
                 + [full(a) for a in operands[1:]],
        out_specs=pl.BlockSpec((1, dim, hw), lambda i: (i, 0, 0)),
        compiler_params=pltpu.CompilerParams(dimension_semantics=("parallel",)),
    )(*operands)
    return out.reshape(b, dim, h, w)


def make_params(dim, num_heads, ffn_expansion_factor, key):
    hidden = int(dim * ffn_expansion_factor)
    ks = jax.random.split(key, 6)
    f32 = jnp.float32
    # 1x1 convs stored as (Cout, Cin) matrices (torch (Cout,Cin,1,1) squeezed);
    # depthwise 3x3 stored as (C, 9) = torch (C,1,3,3) flattened row-major.
    return dict(
        ln1_w=jnp.ones((dim,), f32), ln1_b=jnp.zeros((dim,), f32),
        ln2_w=jnp.ones((dim,), f32), ln2_b=jnp.zeros((dim,), f32),
        temperature=jnp.ones((num_heads,), f32),
        w_qkv=0.2 * jax.random.normal(ks[0], (3 * dim, dim), f32),
        w_qkv_dw=0.2 * jax.random.normal(ks[1], (3 * dim, 9), f32),
        w_proj=0.2 * jax.random.normal(ks[2], (dim, dim), f32),
        w_in=0.2 * jax.random.normal(ks[3], (2 * hidden, dim), f32),
        w_ffn_dw=0.2 * jax.random.normal(ks[4], (2 * hidden, 9), f32),
        w_out=0.2 * jax.random.normal(ks[5], (dim, hidden), f32),
    )


if __name__ == "__main__":
    B, DIM, H, W = 2, 8, 16, 16
    NUM_HEADS, FFN_FACTOR = 2, 2

    key = jax.random.PRNGKey(0)
    kx, kp = jax.random.split(key)
    x = jax.random.normal(kx, (B, DIM, H, W), jnp.float32)
    params = make_params(DIM, NUM_HEADS, FFN_FACTOR, kp)

    fwd = jax.jit(functools.partial(transformer_block, num_heads=NUM_HEADS))
    y = jax.block_until_ready(fwd(x, params))
    assert y.shape == (B, DIM, H, W) and y.dtype == jnp.float32
    assert bool(jnp.all(jnp.isfinite(y)))
    print("KERNEL_OK")
</pallas_src>

<mosaic_0001>
module attributes {stable_mosaic.version = 11 : i64} {
  func.func @_block_kernel(%arg0: i32, %arg1: memref<1x8x256xf32, #tpu.memory_space<vmem>>, %arg2: memref<9x256xf32, #tpu.memory_space<vmem>>, %arg3: memref<8x8xf32, #tpu.memory_space<vmem>>, %arg4: memref<8x1xf32, #tpu.memory_space<vmem>>, %arg5: memref<8x1xf32, #tpu.memory_space<vmem>>, %arg6: memref<8x1xf32, #tpu.memory_space<vmem>>, %arg7: memref<24x8xf32, #tpu.memory_space<vmem>>, %arg8: memref<24x9xf32, #tpu.memory_space<vmem>>, %arg9: memref<8x8xf32, #tpu.memory_space<vmem>>, %arg10: memref<8x1xf32, #tpu.memory_space<vmem>>, %arg11: memref<8x1xf32, #tpu.memory_space<vmem>>, %arg12: memref<32x8xf32, #tpu.memory_space<vmem>>, %arg13: memref<32x9xf32, #tpu.memory_space<vmem>>, %arg14: memref<8x16xf32, #tpu.memory_space<vmem>>, %arg15: memref<1x8x256xf32, #tpu.memory_space<vmem>>) attributes {dimension_semantics = [#tpu.dimension_semantics<parallel>], iteration_bounds = array<i64: 2>, scalar_prefetch = 0 : i64, scratch_operands = 0 : i64, tpu.core_type = #tpu.core_type<tc>, window_params = [{transform_indices = @transform_0, window_bounds = array<i64: 1, 8, 256>}, {pipeline_mode = #tpu.pipeline_mode<synchronous>, transform_indices = @transform_1, window_bounds = array<i64: 9, 256>}, {pipeline_mode = #tpu.pipeline_mode<synchronous>, transform_indices = @transform_2, window_bounds = array<i64: 8, 8>}, {pipeline_mode = #tpu.pipeline_mode<synchronous>, transform_indices = @transform_3, window_bounds = array<i64: 8, 1>}, {pipeline_mode = #tpu.pipeline_mode<synchronous>, transform_indices = @transform_4, window_bounds = array<i64: 8, 1>}, {pipeline_mode = #tpu.pipeline_mode<synchronous>, transform_indices = @transform_5, window_bounds = array<i64: 8, 1>}, {pipeline_mode = #tpu.pipeline_mode<synchronous>, transform_indices = @transform_6, window_bounds = array<i64: 24, 8>}, {pipeline_mode = #tpu.pipeline_mode<synchronous>, transform_indices = @transform_7, window_bounds = array<i64: 24, 9>}, {pipeline_mode = #tpu.pipeline_mode<synchronous>, transform_indices = @transform_8, window_bounds = array<i64: 8, 8>}, {pipeline_mode = #tpu.pipeline_mode<synchronous>, transform_indices = @transform_9, window_bounds = array<i64: 8, 1>}, {pipeline_mode = #tpu.pipeline_mode<synchronous>, transform_indices = @transform_10, window_bounds = array<i64: 8, 1>}, {pipeline_mode = #tpu.pipeline_mode<synchronous>, transform_indices = @transform_11, window_bounds = array<i64: 32, 8>}, {pipeline_mode = #tpu.pipeline_mode<synchronous>, transform_indices = @transform_12, window_bounds = array<i64: 32, 9>}, {pipeline_mode = #tpu.pipeline_mode<synchronous>, transform_indices = @transform_13, window_bounds = array<i64: 8, 16>}, {transform_indices = @transform_14, window_bounds = array<i64: 1, 8, 256>}]} {
    %c0 = arith.constant 0 : index
    %c0_0 = arith.constant 0 : index
    %c0_1 = arith.constant 0 : index
    %0 = vector.load %arg1[%c0, %c0_0, %c0_1] : memref<1x8x256xf32, #tpu.memory_space<vmem>>, vector<1x8x256xf32>
    %1 = vector.shape_cast %0 : vector<1x8x256xf32> to vector<8x256xf32>
    %c0_2 = arith.constant 0 : index
    %c0_3 = arith.constant 0 : index
    %2 = vector.load %arg2[%c0_2, %c0_3] : memref<9x256xf32, #tpu.memory_space<vmem>>, vector<9x256xf32>
    %c0_4 = arith.constant 0 : index
    %c0_5 = arith.constant 0 : index
    %3 = vector.load %arg4[%c0_4, %c0_5] : memref<8x1xf32, #tpu.memory_space<vmem>>, vector<8x1xf32>
    %c0_6 = arith.constant 0 : index
    %c0_7 = arith.constant 0 : index
    %4 = vector.load %arg5[%c0_6, %c0_7] : memref<8x1xf32, #tpu.memory_space<vmem>>, vector<8x1xf32>
    %cst = arith.constant dense<0.000000e+00> : vector<256xf32>
    %5 = vector.multi_reduction <add>, %1, %cst [0] : vector<8x256xf32> to vector<256xf32>
    %6 = vector.shape_cast %5 : vector<256xf32> to vector<1x256xf32>
    %cst_8 = arith.constant 8.000000e+00 : f32
    %7 = vector.broadcast %cst_8 : f32 to vector<1x256xf32>
    %8 = arith.divf %6, %7 : vector<1x256xf32>
    %9 = vector.broadcast %8 : vector<1x256xf32> to vector<8x256xf32>
    %10 = arith.subf %1, %9 : vector<8x256xf32>
    %11 = arith.mulf %10, %10 : vector<8x256xf32>
    %cst_9 = arith.constant dense<0.000000e+00> : vector<256xf32>
    %12 = vector.multi_reduction <add>, %11, %cst_9 [0] : vector<8x256xf32> to vector<256xf32>
    %13 = vector.shape_cast %12 : vector<256xf32> to vector<1x256xf32>
    %cst_10 = arith.constant 8.000000e+00 : f32
    %14 = vector.broadcast %cst_10 : f32 to vector<1x256xf32>
    %15 = arith.divf %13, %14 : vector<1x256xf32>
    %cst_11 = arith.constant 9.99999974E-6 : f32
    %16 = vector.broadcast %cst_11 : f32 to vector<1x256xf32>
    %17 = arith.addf %15, %16 : vector<1x256xf32>
    %18 = math.rsqrt %17 : vector<1x256xf32>
    %19 = vector.broadcast %18 : vector<1x256xf32> to vector<8x256xf32>
    %20 = arith.mulf %10, %19 : vector<8x256xf32>
    %21 = vector.broadcast %3 : vector<8x1xf32> to vector<8x256xf32>
    %22 = arith.mulf %20, %21 : vector<8x256xf32>
    %23 = vector.broadcast %4 : vector<8x1xf32> to vector<8x256xf32>
    %24 = arith.addf %22, %23 : vector<8x256xf32>
    %c0_12 = arith.constant 0 : index
    %c0_13 = arith.constant 0 : index
    %25 = vector.load %arg7[%c0_12, %c0_13] : memref<24x8xf32, #tpu.memory_space<vmem>>, vector<24x8xf32>
    %cst_14 = arith.constant dense<0.000000e+00> : vector<24x256xf32>
    %26 = tpu.matmul %25, %24, %cst_14 {dimension_numbers = #tpu.dot_dimension_numbers<[1], [0], [0], [1], [0, 0, 1, 1], [], []>} : vector<24x8xf32>, vector<8x256xf32>, vector<24x256xf32> -> vector<24x256xf32>
    %c0_15 = arith.constant 0 : index
    %c0_16 = arith.constant 0 : index
    %27 = vector.load %arg8[%c0_15, %c0_16] : memref<24x9xf32, #tpu.memory_space<vmem>>, vector<24x9xf32>
    %cst_17 = arith.constant 0.000000e+00 : f32
    %28 = vector.broadcast %cst_17 : f32 to vector<24x256xf32>
    %c17_i32 = arith.constant 17 : i32
    %29 = tpu.dynamic_rotate %26 by %c17_i32 dim 1 : vector<24x256xf32>, i32 -> vector<24x256xf32>
    %30 = vector.extract_strided_slice %2 {offsets = [0, 0], sizes = [1, 256], strides = [1, 1]} : vector<9x256xf32> to vector<1x256xf32>
    %31 = vector.broadcast %30 : vector<1x256xf32> to vector<24x256xf32>
    %32 = arith.mulf %29, %31 : vector<24x256xf32>
    %33 = vector.extract_strided_slice %27 {offsets = [0, 0], sizes = [24, 1], strides = [1, 1]} : vector<24x9xf32> to vector<24x1xf32>
    %34 = vector.broadcast %33 : vector<24x1xf32> to vector<24x256xf32>
    %35 = arith.mulf %32, %34 : vector<24x256xf32>
    %36 = arith.addf %28, %35 : vector<24x256xf32>
    %c16_i32 = arith.constant 16 : i32
    %37 = tpu.dynamic_rotate %26 by %c16_i32 dim 1 : vector<24x256xf32>, i32 -> vector<24x256xf32>
    %38 = vector.extract_strided_slice %2 {offsets = [1, 0], sizes = [1, 256], strides = [1, 1]} : vector<9x256xf32> to vector<1x256xf32>
    %39 = vector.broadcast %38 : vector<1x256xf32> to vector<24x256xf32>
    %40 = arith.mulf %37, %39 : vector<24x256xf32>
    %41 = vector.extract_strided_slice %27 {offsets = [0, 1], sizes = [24, 1], strides = [1, 1]} : vector<24x9xf32> to vector<24x1xf32>
    %42 = vector.broadcast %41 : vector<24x1xf32> to vector<24x256xf32>
    %43 = arith.mulf %40, %42 : vector<24x256xf32>
    %44 = arith.addf %36, %43 : vector<24x256xf32>
    %c15_i32 = arith.constant 15 : i32
    %45 = tpu.dynamic_rotate %26 by %c15_i32 dim 1 : vector<24x256xf32>, i32 -> vector<24x256xf32>
    %46 = vector.extract_strided_slice %2 {offsets = [2, 0], sizes = [1, 256], strides = [1, 1]} : vector<9x256xf32> to vector<1x256xf32>
    %47 = vector.broadcast %46 : vector<1x256xf32> to vector<24x256xf32>
    %48 = arith.mulf %45, %47 : vector<24x256xf32>
    %49 = vector.extract_strided_slice %27 {offsets = [0, 2], sizes = [24, 1], strides = [1, 1]} : vector<24x9xf32> to vector<24x1xf32>
    %50 = vector.broadcast %49 : vector<24x1xf32> to vector<24x256xf32>
    %51 = arith.mulf %48, %50 : vector<24x256xf32>
    %52 = arith.addf %44, %51 : vector<24x256xf32>
    %c1_i32 = arith.constant 1 : i32
    %53 = tpu.dynamic_rotate %26 by %c1_i32 dim 1 : vector<24x256xf32>, i32 -> vector<24x256xf32>
    %54 = vector.extract_strided_slice %2 {offsets = [3, 0], sizes = [1, 256], strides = [1, 1]} : vector<9x256xf32> to vector<1x256xf32>
    %55 = vector.broadcast %54 : vector<1x256xf32> to vector<24x256xf32>
    %56 = arith.mulf %53, %55 : vector<24x256xf32>
    %57 = vector.extract_strided_slice %27 {offsets = [0, 3], sizes = [24, 1], strides = [1, 1]} : vector<24x9xf32> to vector<24x1xf32>
    %58 = vector.broadcast %57 : vector<24x1xf32> to vector<24x256xf32>
    %59 = arith.mulf %56, %58 : vector<24x256xf32>
    %60 = arith.addf %52, %59 : vector<24x256xf32>
    %61 = vector.extract_strided_slice %2 {offsets = [4, 0], sizes = [1, 256], strides = [1, 1]} : vector<9x256xf32> to vector<1x256xf32>
    %62 = vector.broadcast %61 : vector<1x256xf32> to vector<24x256xf32>
    %63 = arith.mulf %26, %62 : vector<24x256xf32>
    %64 = vector.extract_strided_slice %27 {offsets = [0, 4], sizes = [24, 1], strides = [1, 1]} : vector<24x9xf32> to vector<24x1xf32>
    %65 = vector.broadcast %64 : vector<24x1xf32> to vector<24x256xf32>
    %66 = arith.mulf %63, %65 : vector<24x256xf32>
    %67 = arith.addf %60, %66 : vector<24x256xf32>
    %c255_i32 = arith.constant 255 : i32
    %68 = tpu.dynamic_rotate %26 by %c255_i32 dim 1 : vector<24x256xf32>, i32 -> vector<24x256xf32>
    %69 = vector.extract_strided_slice %2 {offsets = [5, 0], sizes = [1, 256], strides = [1, 1]} : vector<9x256xf32> to vector<1x256xf32>
    %70 = vector.broadcast %69 : vector<1x256xf32> to vector<24x256xf32>
    %71 = arith.mulf %68, %70 : vector<24x256xf32>
    %72 = vector.extract_strided_slice %27 {offsets = [0, 5], sizes = [24, 1], strides = [1, 1]} : vector<24x9xf32> to vector<24x1xf32>
    %73 = vector.broadcast %72 : vector<24x1xf32> to vector<24x256xf32>
    %74 = arith.mulf %71, %73 : vector<24x256xf32>
    %75 = arith.addf %67, %74 : vector<24x256xf32>
    %c241_i32 = arith.constant 241 : i32
    %76 = tpu.dynamic_rotate %26 by %c241_i32 dim 1 : vector<24x256xf32>, i32 -> vector<24x256xf32>
    %77 = vector.extract_strided_slice %2 {offsets = [6, 0], sizes = [1, 256], strides = [1, 1]} : vector<9x256xf32> to vector<1x256xf32>
    %78 = vector.broadcast %77 : vector<1x256xf32> to vector<24x256xf32>
    %79 = arith.mulf %76, %78 : vector<24x256xf32>
    %80 = vector.extract_strided_slice %27 {offsets = [0, 6], sizes = [24, 1], strides = [1, 1]} : vector<24x9xf32> to vector<24x1xf32>
    %81 = vector.broadcast %80 : vector<24x1xf32> to vector<24x256xf32>
    %82 = arith.mulf %79, %81 : vector<24x256xf32>
    %83 = arith.addf %75, %82 : vector<24x256xf32>
    %c240_i32 = arith.constant 240 : i32
    %84 = tpu.dynamic_rotate %26 by %c240_i32 dim 1 : vector<24x256xf32>, i32 -> vector<24x256xf32>
    %85 = vector.extract_strided_slice %2 {offsets = [7, 0], sizes = [1, 256], strides = [1, 1]} : vector<9x256xf32> to vector<1x256xf32>
    %86 = vector.broadcast %85 : vector<1x256xf32> to vector<24x256xf32>
    %87 = arith.mulf %84, %86 : vector<24x256xf32>
    %88 = vector.extract_strided_slice %27 {offsets = [0, 7], sizes = [24, 1], strides = [1, 1]} : vector<24x9xf32> to vector<24x1xf32>
    %89 = vector.broadcast %88 : vector<24x1xf32> to vector<24x256xf32>
    %90 = arith.mulf %87, %89 : vector<24x256xf32>
    %91 = arith.addf %83, %90 : vector<24x256xf32>
    %c239_i32 = arith.constant 239 : i32
    %92 = tpu.dynamic_rotate %26 by %c239_i32 dim 1 : vector<24x256xf32>, i32 -> vector<24x256xf32>
    %93 = vector.extract_strided_slice %2 {offsets = [8, 0], sizes = [1, 256], strides = [1, 1]} : vector<9x256xf32> to vector<1x256xf32>
    %94 = vector.broadcast %93 : vector<1x256xf32> to vector<24x256xf32>
    %95 = arith.mulf %92, %94 : vector<24x256xf32>
    %96 = vector.extract_strided_slice %27 {offsets = [0, 8], sizes = [24, 1], strides = [1, 1]} : vector<24x9xf32> to vector<24x1xf32>
    %97 = vector.broadcast %96 : vector<24x1xf32> to vector<24x256xf32>
    %98 = arith.mulf %95, %97 : vector<24x256xf32>
    %99 = arith.addf %91, %98 : vector<24x256xf32>
    %100 = vector.extract_strided_slice %99 {offsets = [0, 0], sizes = [8, 256], strides = [1, 1]} : vector<24x256xf32> to vector<8x256xf32>
    %101 = vector.extract_strided_slice %99 {offsets = [8, 0], sizes = [8, 256], strides = [1, 1]} : vector<24x256xf32> to vector<8x256xf32>
    %102 = vector.extract_strided_slice %99 {offsets = [16, 0], sizes = [8, 256], strides = [1, 1]} : vector<24x256xf32> to vector<8x256xf32>
    %103 = arith.mulf %100, %100 : vector<8x256xf32>
    %cst_18 = arith.constant dense<0.000000e+00> : vector<8xf32>
    %104 = vector.multi_reduction <add>, %103, %cst_18 [1] : vector<8x256xf32> to vector<8xf32>
    %105 = vector.shape_cast %104 : vector<8xf32> to vector<8x1xf32>
    %106 = math.sqrt %105 : vector<8x1xf32>
    %cst_19 = arith.constant 9.99999996E-13 : f32
    %107 = vector.broadcast %cst_19 : f32 to vector<8x1xf32>
    %108 = arith.maximumf %106, %107 : vector<8x1xf32>
    %109 = vector.broadcast %108 : vector<8x1xf32> to vector<8x256xf32>
    %110 = arith.divf %100, %109 : vector<8x256xf32>
    %111 = arith.mulf %101, %101 : vector<8x256xf32>
    %cst_20 = arith.constant dense<0.000000e+00> : vector<8xf32>
    %112 = vector.multi_reduction <add>, %111, %cst_20 [1] : vector<8x256xf32> to vector<8xf32>
    %113 = vector.shape_cast %112 : vector<8xf32> to vector<8x1xf32>
    %114 = math.sqrt %113 : vector<8x1xf32>
    %cst_21 = arith.constant 9.99999996E-13 : f32
    %115 = vector.broadcast %cst_21 : f32 to vector<8x1xf32>
    %116 = arith.maximumf %114, %115 : vector<8x1xf32>
    %117 = vector.broadcast %116 : vector<8x1xf32> to vector<8x256xf32>
    %118 = arith.divf %101, %117 : vector<8x256xf32>
    %c0_22 = arith.constant 0 : index
    %c0_23 = arith.constant 0 : index
    %119 = vector.load %arg6[%c0_22, %c0_23] : memref<8x1xf32, #tpu.memory_space<vmem>>, vector<8x1xf32>
    %120 = vector.broadcast %119 : vector<8x1xf32> to vector<8x256xf32>
    %121 = arith.mulf %110, %120 : vector<8x256xf32>
    %cst_24 = arith.constant dense<0.000000e+00> : vector<8x8xf32>
    %122 = tpu.matmul %121, %118, %cst_24 {dimension_numbers = #tpu.dot_dimension_numbers<[1], [1], [0], [0], [0, 0, 1, 0], [], []>} : vector<8x256xf32>, vector<8x256xf32>, vector<8x8xf32> -> vector<8x8xf32>
    %c0_25 = arith.constant 0 : index
    %c0_26 = arith.constant 0 : index
    %123 = vector.load %arg3[%c0_25, %c0_26] : memref<8x8xf32, #tpu.memory_space<vmem>>, vector<8x8xf32>
    %124 = arith.addf %122, %123 : vector<8x8xf32>
    %cst_27 = arith.constant dense<0xFF800000> : vector<8xf32>
    %125 = vector.multi_reduction <maximumf>, %124, %cst_27 [1] : vector<8x8xf32> to vector<8xf32>
    %126 = vector.shape_cast %125 : vector<8xf32> to vector<8x1xf32>
    %127 = vector.broadcast %126 : vector<8x1xf32> to vector<8x8xf32>
    %128 = arith.subf %124, %127 : vector<8x8xf32>
    %129 = math.exp %128 : vector<8x8xf32>
    %cst_28 = arith.constant dense<0.000000e+00> : vector<8xf32>
    %130 = vector.multi_reduction <add>, %129, %cst_28 [1] : vector<8x8xf32> to vector<8xf32>
    %131 = vector.shape_cast %130 : vector<8xf32> to vector<8x1xf32>
    %132 = tpu.reciprocal %131 {approx = true} : vector<8x1xf32> -> vector<8x1xf32>
    %133 = vector.broadcast %132 : vector<8x1xf32> to vector<8x8xf32>
    %134 = arith.mulf %129, %133 : vector<8x8xf32>
    %cst_29 = arith.constant dense<0.000000e+00> : vector<8x256xf32>
    %135 = tpu.matmul %134, %102, %cst_29 {dimension_numbers = #tpu.dot_dimension_numbers<[1], [0], [0], [1], [0, 0, 1, 1], [], []>} : vector<8x8xf32>, vector<8x256xf32>, vector<8x256xf32> -> vector<8x256xf32>
    %c0_30 = arith.constant 0 : index
    %c0_31 = arith.constant 0 : index
    %136 = vector.load %arg9[%c0_30, %c0_31] : memref<8x8xf32, #tpu.memory_space<vmem>>, vector<8x8xf32>
    %cst_32 = arith.constant dense<0.000000e+00> : vector<8x256xf32>
    %137 = tpu.matmul %136, %135, %cst_32 {dimension_numbers = #tpu.dot_dimension_numbers<[1], [0], [0], [1], [0, 0, 1, 1], [], []>} : vector<8x8xf32>, vector<8x256xf32>, vector<8x256xf32> -> vector<8x256xf32>
    %138 = arith.addf %1, %137 : vector<8x256xf32>
    %c0_33 = arith.constant 0 : index
    %c0_34 = arith.constant 0 : index
    %139 = vector.load %arg10[%c0_33, %c0_34] : memref<8x1xf32, #tpu.memory_space<vmem>>, vector<8x1xf32>
    %c0_35 = arith.constant 0 : index
    %c0_36 = arith.constant 0 : index
    %140 = vector.load %arg11[%c0_35, %c0_36] : memref<8x1xf32, #tpu.memory_space<vmem>>, vector<8x1xf32>
    %cst_37 = arith.constant dense<0.000000e+00> : vector<256xf32>
    %141 = vector.multi_reduction <add>, %138, %cst_37 [0] : vector<8x256xf32> to vector<256xf32>
    %142 = vector.shape_cast %141 : vector<256xf32> to vector<1x256xf32>
    %cst_38 = arith.constant 8.000000e+00 : f32
    %143 = vector.broadcast %cst_38 : f32 to vector<1x256xf32>
    %144 = arith.divf %142, %143 : vector<1x256xf32>
    %145 = vector.broadcast %144 : vector<1x256xf32> to vector<8x256xf32>
    %146 = arith.subf %138, %145 : vector<8x256xf32>
    %147 = arith.mulf %146, %146 : vector<8x256xf32>
    %cst_39 = arith.constant dense<0.000000e+00> : vector<256xf32>
    %148 = vector.multi_reduction <add>, %147, %cst_39 [0] : vector<8x256xf32> to vector<256xf32>
    %149 = vector.shape_cast %148 : vector<256xf32> to vector<1x256xf32>
    %cst_40 = arith.constant 8.000000e+00 : f32
    %150 = vector.broadcast %cst_40 : f32 to vector<1x256xf32>
    %151 = arith.divf %149, %150 : vector<1x256xf32>
    %cst_41 = arith.constant 9.99999974E-6 : f32
    %152 = vector.broadcast %cst_41 : f32 to vector<1x256xf32>
    %153 = arith.addf %151, %152 : vector<1x256xf32>
    %154 = math.rsqrt %153 : vector<1x256xf32>
    %155 = vector.broadcast %154 : vector<1x256xf32> to vector<8x256xf32>
    %156 = arith.mulf %146, %155 : vector<8x256xf32>
    %157 = vector.broadcast %139 : vector<8x1xf32> to vector<8x256xf32>
    %158 = arith.mulf %156, %157 : vector<8x256xf32>
    %159 = vector.broadcast %140 : vector<8x1xf32> to vector<8x256xf32>
    %160 = arith.addf %158, %159 : vector<8x256xf32>
    %c0_42 = arith.constant 0 : index
    %c0_43 = arith.constant 0 : index
    %161 = vector.load %arg12[%c0_42, %c0_43] : memref<32x8xf32, #tpu.memory_space<vmem>>, vector<32x8xf32>
    %cst_44 = arith.constant dense<0.000000e+00> : vector<32x256xf32>
    %162 = tpu.matmul %161, %160, %cst_44 {dimension_numbers = #tpu.dot_dimension_numbers<[1], [0], [0], [1], [0, 0, 1, 1], [], []>} : vector<32x8xf32>, vector<8x256xf32>, vector<32x256xf32> -> vector<32x256xf32>
    %c0_45 = arith.constant 0 : index
    %c0_46 = arith.constant 0 : index
    %163 = vector.load %arg13[%c0_45, %c0_46] : memref<32x9xf32, #tpu.memory_space<vmem>>, vector<32x9xf32>
    %cst_47 = arith.constant 0.000000e+00 : f32
    %164 = vector.broadcast %cst_47 : f32 to vector<32x256xf32>
    %c17_i32_48 = arith.constant 17 : i32
    %165 = tpu.dynamic_rotate %162 by %c17_i32_48 dim 1 : vector<32x256xf32>, i32 -> vector<32x256xf32>
    %166 = vector.extract_strided_slice %2 {offsets = [0, 0], sizes = [1, 256], strides = [1, 1]} : vector<9x256xf32> to vector<1x256xf32>
    %167 = vector.broadcast %166 : vector<1x256xf32> to vector<32x256xf32>
    %168 = arith.mulf %165, %167 : vector<32x256xf32>
    %169 = vector.extract_strided_slice %163 {offsets = [0, 0], sizes = [32, 1], strides = [1, 1]} : vector<32x9xf32> to vector<32x1xf32>
    %170 = vector.broadcast %169 : vector<32x1xf32> to vector<32x256xf32>
    %171 = arith.mulf %168, %170 : vector<32x256xf32>
    %172 = arith.addf %164, %171 : vector<32x256xf32>
    %c16_i32_49 = arith.constant 16 : i32
    %173 = tpu.dynamic_rotate %162 by %c16_i32_49 dim 1 : vector<32x256xf32>, i32 -> vector<32x256xf32>
    %174 = vector.extract_strided_slice %2 {offsets = [1, 0], sizes = [1, 256], strides = [1, 1]} : vector<9x256xf32> to vector<1x256xf32>
    %175 = vector.broadcast %174 : vector<1x256xf32> to vector<32x256xf32>
    %176 = arith.mulf %173, %175 : vector<32x256xf32>
    %177 = vector.extract_strided_slice %163 {offsets = [0, 1], sizes = [32, 1], strides = [1, 1]} : vector<32x9xf32> to vector<32x1xf32>
    %178 = vector.broadcast %177 : vector<32x1xf32> to vector<32x256xf32>
    %179 = arith.mulf %176, %178 : vector<32x256xf32>
    %180 = arith.addf %172, %179 : vector<32x256xf32>
    %c15_i32_50 = arith.constant 15 : i32
    %181 = tpu.dynamic_rotate %162 by %c15_i32_50 dim 1 : vector<32x256xf32>, i32 -> vector<32x256xf32>
    %182 = vector.extract_strided_slice %2 {offsets = [2, 0], sizes = [1, 256], strides = [1, 1]} : vector<9x256xf32> to vector<1x256xf32>
    %183 = vector.broadcast %182 : vector<1x256xf32> to vector<32x256xf32>
    %184 = arith.mulf %181, %183 : vector<32x256xf32>
    %185 = vector.extract_strided_slice %163 {offsets = [0, 2], sizes = [32, 1], strides = [1, 1]} : vector<32x9xf32> to vector<32x1xf32>
    %186 = vector.broadcast %185 : vector<32x1xf32> to vector<32x256xf32>
    %187 = arith.mulf %184, %186 : vector<32x256xf32>
    %188 = arith.addf %180, %187 : vector<32x256xf32>
    %c1_i32_51 = arith.constant 1 : i32
    %189 = tpu.dynamic_rotate %162 by %c1_i32_51 dim 1 : vector<32x256xf32>, i32 -> vector<32x256xf32>
    %190 = vector.extract_strided_slice %2 {offsets = [3, 0], sizes = [1, 256], strides = [1, 1]} : vector<9x256xf32> to vector<1x256xf32>
    %191 = vector.broadcast %190 : vector<1x256xf32> to vector<32x256xf32>
    %192 = arith.mulf %189, %191 : vector<32x256xf32>
    %193 = vector.extract_strided_slice %163 {offsets = [0, 3], sizes = [32, 1], strides = [1, 1]} : vector<32x9xf32> to vector<32x1xf32>
    %194 = vector.broadcast %193 : vector<32x1xf32> to vector<32x256xf32>
    %195 = arith.mulf %192, %194 : vector<32x256xf32>
    %196 = arith.addf %188, %195 : vector<32x256xf32>
    %197 = vector.extract_strided_slice %2 {offsets = [4, 0], sizes = [1, 256], strides = [1, 1]} : vector<9x256xf32> to vector<1x256xf32>
    %198 = vector.broadcast %197 : vector<1x256xf32> to vector<32x256xf32>
    %199 = arith.mulf %162, %198 : vector<32x256xf32>
    %200 = vector.extract_strided_slice %163 {offsets = [0, 4], sizes = [32, 1], strides = [1, 1]} : vector<32x9xf32> to vector<32x1xf32>
    %201 = vector.broadcast %200 : vector<32x1xf32> to vector<32x256xf32>
    %202 = arith.mulf %199, %201 : vector<32x256xf32>
    %203 = arith.addf %196, %202 : vector<32x256xf32>
    %c255_i32_52 = arith.constant 255 : i32
    %204 = tpu.dynamic_rotate %162 by %c255_i32_52 dim 1 : vector<32x256xf32>, i32 -> vector<32x256xf32>
    %205 = vector.extract_strided_slice %2 {offsets = [5, 0], sizes = [1, 256], strides = [1, 1]} : vector<9x256xf32> to vector<1x256xf32>
    %206 = vector.broadcast %205 : vector<1x256xf32> to vector<32x256xf32>
    %207 = arith.mulf %204, %206 : vector<32x256xf32>
    %208 = vector.extract_strided_slice %163 {offsets = [0, 5], sizes = [32, 1], strides = [1, 1]} : vector<32x9xf32> to vector<32x1xf32>
    %209 = vector.broadcast %208 : vector<32x1xf32> to vector<32x256xf32>
    %210 = arith.mulf %207, %209 : vector<32x256xf32>
    %211 = arith.addf %203, %210 : vector<32x256xf32>
    %c241_i32_53 = arith.constant 241 : i32
    %212 = tpu.dynamic_rotate %162 by %c241_i32_53 dim 1 : vector<32x256xf32>, i32 -> vector<32x256xf32>
    %213 = vector.extract_strided_slice %2 {offsets = [6, 0], sizes = [1, 256], strides = [1, 1]} : vector<9x256xf32> to vector<1x256xf32>
    %214 = vector.broadcast %213 : vector<1x256xf32> to vector<32x256xf32>
    %215 = arith.mulf %212, %214 : vector<32x256xf32>
    %216 = vector.extract_strided_slice %163 {offsets = [0, 6], sizes = [32, 1], strides = [1, 1]} : vector<32x9xf32> to vector<32x1xf32>
    %217 = vector.broadcast %216 : vector<32x1xf32> to vector<32x256xf32>
    %218 = arith.mulf %215, %217 : vector<32x256xf32>
    %219 = arith.addf %211, %218 : vector<32x256xf32>
    %c240_i32_54 = arith.constant 240 : i32
    %220 = tpu.dynamic_rotate %162 by %c240_i32_54 dim 1 : vector<32x256xf32>, i32 -> vector<32x256xf32>
    %221 = vector.extract_strided_slice %2 {offsets = [7, 0], sizes = [1, 256], strides = [1, 1]} : vector<9x256xf32> to vector<1x256xf32>
    %222 = vector.broadcast %221 : vector<1x256xf32> to vector<32x256xf32>
    %223 = arith.mulf %220, %222 : vector<32x256xf32>
    %224 = vector.extract_strided_slice %163 {offsets = [0, 7], sizes = [32, 1], strides = [1, 1]} : vector<32x9xf32> to vector<32x1xf32>
    %225 = vector.broadcast %224 : vector<32x1xf32> to vector<32x256xf32>
    %226 = arith.mulf %223, %225 : vector<32x256xf32>
    %227 = arith.addf %219, %226 : vector<32x256xf32>
    %c239_i32_55 = arith.constant 239 : i32
    %228 = tpu.dynamic_rotate %162 by %c239_i32_55 dim 1 : vector<32x256xf32>, i32 -> vector<32x256xf32>
    %229 = vector.extract_strided_slice %2 {offsets = [8, 0], sizes = [1, 256], strides = [1, 1]} : vector<9x256xf32> to vector<1x256xf32>
    %230 = vector.broadcast %229 : vector<1x256xf32> to vector<32x256xf32>
    %231 = arith.mulf %228, %230 : vector<32x256xf32>
    %232 = vector.extract_strided_slice %163 {offsets = [0, 8], sizes = [32, 1], strides = [1, 1]} : vector<32x9xf32> to vector<32x1xf32>
    %233 = vector.broadcast %232 : vector<32x1xf32> to vector<32x256xf32>
    %234 = arith.mulf %231, %233 : vector<32x256xf32>
    %235 = arith.addf %227, %234 : vector<32x256xf32>
    %236 = vector.extract_strided_slice %235 {offsets = [0, 0], sizes = [16, 256], strides = [1, 1]} : vector<32x256xf32> to vector<16x256xf32>
    %237 = vector.extract_strided_slice %235 {offsets = [16, 0], sizes = [16, 256], strides = [1, 1]} : vector<32x256xf32> to vector<16x256xf32>
    %cst_56 = arith.constant 5.000000e-01 : f32
    %238 = vector.broadcast %cst_56 : f32 to vector<16x256xf32>
    %239 = arith.mulf %238, %236 : vector<16x256xf32>
    %cst_57 = arith.constant 0.707106769 : f32
    %240 = vector.broadcast %cst_57 : f32 to vector<16x256xf32>
    %241 = arith.mulf %236, %240 : vector<16x256xf32>
    %242 = math.erf %241 : vector<16x256xf32>
    %cst_58 = arith.constant 1.000000e+00 : f32
    %243 = vector.broadcast %cst_58 : f32 to vector<16x256xf32>
    %244 = arith.addf %243, %242 : vector<16x256xf32>
    %245 = arith.mulf %239, %244 : vector<16x256xf32>
    %246 = arith.mulf %245, %237 : vector<16x256xf32>
    %c0_59 = arith.constant 0 : index
    %c0_60 = arith.constant 0 : index
    %247 = vector.load %arg14[%c0_59, %c0_60] : memref<8x16xf32, #tpu.memory_space<vmem>>, vector<8x16xf32>
    %cst_61 = arith.constant dense<0.000000e+00> : vector<8x256xf32>
    %248 = tpu.matmul %247, %246, %cst_61 {dimension_numbers = #tpu.dot_dimension_numbers<[1], [0], [0], [1], [0, 0, 1, 1], [], []>} : vector<8x16xf32>, vector<16x256xf32>, vector<8x256xf32> -> vector<8x256xf32>
    %249 = arith.addf %138, %248 : vector<8x256xf32>
    %c0_62 = arith.constant 0 : index
    %c0_63 = arith.constant 0 : index
    %c0_64 = arith.constant 0 : index
    %250 = vector.load %arg15[%c0_62, %c0_63, %c0_64] : memref<1x8x256xf32, #tpu.memory_space<vmem>>, vector<1x8x256xf32>
    %251 = vector.shape_cast %250 : vector<1x8x256xf32> to vector<8x256xf32>
    %252 = vector.shape_cast %249 : vector<8x256xf32> to vector<1x8x256xf32>
    tpu.vector_store %arg15[%c0_62, %c0_63, %c0_64], %252 {strides = array<i32>} : memref<1x8x256xf32, #tpu.memory_space<vmem>>, vector<1x8x256xf32>,
    return
  }
  func.func @transform_0(%arg0: i32) -> (i32, i32, i32) {
    %c0_i32 = arith.constant 0 : i32
    %c0_i32_0 = arith.constant 0 : i32
    %c0_i32_1 = arith.constant 0 : i32
    return %arg0, %c0_i32, %c0_i32_0 : i32, i32, i32
  }
  func.func @transform_1(%arg0: i32) -> (i32, i32) {
    %c0_i32 = arith.constant 0 : i32
    %c0_i32_0 = arith.constant 0 : i32
    %c0_i32_1 = arith.constant 0 : i32
    return %c0_i32, %c0_i32_0 : i32, i32
  }
  func.func @transform_2(%arg0: i32) -> (i32, i32) {
    %c0_i32 = arith.constant 0 : i32
    %c0_i32_0 = arith.constant 0 : i32
    %c0_i32_1 = arith.constant 0 : i32
    return %c0_i32, %c0_i32_0 : i32, i32
  }
  func.func @transform_3(%arg0: i32) -> (i32, i32) {
    %c0_i32 = arith.constant 0 : i32
    %c0_i32_0 = arith.constant 0 : i32
    %c0_i32_1 = arith.constant 0 : i32
    return %c0_i32, %c0_i32_0 : i32, i32
  }
  func.func @transform_4(%arg0: i32) -> (i32, i32) {
    %c0_i32 = arith.constant 0 : i32
    %c0_i32_0 = arith.constant 0 : i32
    %c0_i32_1 = arith.constant 0 : i32
    return %c0_i32, %c0_i32_0 : i32, i32
  }
  func.func @transform_5(%arg0: i32) -> (i32, i32) {
    %c0_i32 = arith.constant 0 : i32
    %c0_i32_0 = arith.constant 0 : i32
    %c0_i32_1 = arith.constant 0 : i32
    return %c0_i32, %c0_i32_0 : i32, i32
  }
  func.func @transform_6(%arg0: i32) -> (i32, i32) {
    %c0_i32 = arith.constant 0 : i32
    %c0_i32_0 = arith.constant 0 : i32
    %c0_i32_1 = arith.constant 0 : i32
    return %c0_i32, %c0_i32_0 : i32, i32
  }
  func.func @transform_7(%arg0: i32) -> (i32, i32) {
    %c0_i32 = arith.constant 0 : i32
    %c0_i32_0 = arith.constant 0 : i32
    %c0_i32_1 = arith.constant 0 : i32
    return %c0_i32, %c0_i32_0 : i32, i32
  }
  func.func @transform_8(%arg0: i32) -> (i32, i32) {
    %c0_i32 = arith.constant 0 : i32
    %c0_i32_0 = arith.constant 0 : i32
    %c0_i32_1 = arith.constant 0 : i32
    return %c0_i32, %c0_i32_0 : i32, i32
  }
  func.func @transform_9(%arg0: i32) -> (i32, i32) {
    %c0_i32 = arith.constant 0 : i32
    %c0_i32_0 = arith.constant 0 : i32
    %c0_i32_1 = arith.constant 0 : i32
    return %c0_i32, %c0_i32_0 : i32, i32
  }
  func.func @transform_10(%arg0: i32) -> (i32, i32) {
    %c0_i32 = arith.constant 0 : i32
    %c0_i32_0 = arith.constant 0 : i32
    %c0_i32_1 = arith.constant 0 : i32
    return %c0_i32, %c0_i32_0 : i32, i32
  }
  func.func @transform_11(%arg0: i32) -> (i32, i32) {
    %c0_i32 = arith.constant 0 : i32
    %c0_i32_0 = arith.constant 0 : i32
    %c0_i32_1 = arith.constant 0 : i32
    return %c0_i32, %c0_i32_0 : i32, i32
  }
  func.func @transform_12(%arg0: i32) -> (i32, i32) {
    %c0_i32 = arith.constant 0 : i32
    %c0_i32_0 = arith.constant 0 : i32
    %c0_i32_1 = arith.constant 0 : i32
    return %c0_i32, %c0_i32_0 : i32, i32
  }
  func.func @transform_13(%arg0: i32) -> (i32, i32) {
    %c0_i32 = arith.constant 0 : i32
    %c0_i32_0 = arith.constant 0 : i32
    %c0_i32_1 = arith.constant 0 : i32
    return %c0_i32, %c0_i32_0 : i32, i32
  }
  func.func @transform_14(%arg0: i32) -> (i32, i32, i32) {
    %c0_i32 = arith.constant 0 : i32
    %c0_i32_0 = arith.constant 0 : i32
    %c0_i32_1 = arith.constant 0 : i32
    return %arg0, %c0_i32, %c0_i32_0 : i32, i32, i32
  }
}

</mosaic_0001>

<bundles_post_ra>
// kernel: transformer_block.1
= control target key start
LH: loop header
LB: loop body
LE: loop exit
PB: predicated region body
PF: predicated region fallthrough
CT: control target
= control target key end

     0   :  { %s2520_s29 = smov 0   ;;  %s3784_s0 = inlined_call_operand.vmem [shape: f32[2,8,256], index: 0, kind: input, shape index: {}]   ;;  %s3785_s1 = inlined_call_operand.vmem [shape: f32[9,256], index: 1, kind: input, shape index: {}]   ;;  %s3786_s2 = inlined_call_operand.vmem [shape: f32[8,8], index: 2, kind: input, shape index: {}]   ;;  %s3787_s3 = inlined_call_operand.vmem [shape: f32[8,1], index: 3, kind: input, shape index: {}]   ;;  %s3788_s4 = inlined_call_operand.vmem [shape: f32[8,1], index: 4, kind: input, shape index: {}]   ;;  %s3789_s5 = inlined_call_operand.vmem [shape: f32[8,1], index: 5, kind: input, shape index: {}]   ;;  %s3790_s6 = inlined_call_operand.vmem [shape: f32[24,8], index: 6, kind: input, shape index: {}]   ;;  %s3791_s7 = inlined_call_operand.vmem [shape: f32[24,9], index: 7, kind: input, shape index: {}]   ;;  %s3792_s8 = inlined_call_operand.vmem [shape: f32[8,8], index: 8, kind: input, shape index: {}]   ;;  %s3793_s9 = inlined_call_operand.vmem [shape: f32[8,1], index: 9, kind: input, shape index: {}]   ;;  %s3794_s10 = inlined_call_operand.vmem [shape: f32[8,1], index: 10, kind: input, shape index: {}]   ;;  %s3795_s11 = inlined_call_operand.vmem [shape: f32[32,8], index: 11, kind: input, shape index: {}]   ;;  %s3796_s12 = inlined_call_operand.vmem [shape: f32[32,9], index: 12, kind: input, shape index: {}]   ;;  %s3797_s13 = inlined_call_operand.vmem [shape: f32[8,16], index: 13, kind: input, shape index: {}]   ;;  %s3798_s14 = inlined_call_operand.vmem [shape: f32[2,8,256], index: 14, kind: output, shape index: {}]  }
   0x1 LB: > { %s2278_s30 = sadd.s32 4294967295, %s2425_s29   ;;  %p2282_p0 = scmp.ge.s32.totalorder %s2425_s29, 1  ;;  %s2425_s29 = sphi %s2520_s29, %s24_s29  }
   0x2   : > { %p412_p1 = scmp.lt.s32.totalorder %s2425_s29, 3 }
   0x4   : > { %p413_p2 = pnand %p2282_p0, %p412_p1 }
   0x6   : > { %416 = sbr.rel (%p413_p2) target bundleno = 2457 (0x999), region = 76 }
   0xd   : > { %v474_v0 = vld [vmem:[%s3787_s3] sm:$0xff]  ;;  %v3807_v1 = vmov 0   ;;  %v3799_v3 = vmov 0.0   ;;  %v626_v4 = vld [vmem:[%s3791_s7 + $0x8] sm:$0xff]  ;;  %v3817_v5 = vmov 2   ;;  %v3815_v7 = vmov 1  }
   0xe   : > { %2335 = vset.pattern.permute.xlu0 %v3807_v1  ;;  %2336 = vset.pattern.permute.xlu1 %v3807_v1  ;;  %v475_v2 = vld [vmem:[%s3788_s4] sm:$0xff]  ;;  %v3811_v8 = vmov 3   ;;  %v3813_v9 = vmov 4   ;;  %p458_p3 = scmp.lt.s32.totalorder %s2278_s30, 1  ;;  %v3809_v10 = vmov 5   ;;  %v3803_v11 = vmov 7  }
   0xf   : > { %517 = vperm.xlu0 %2335, %v474_v0   ;;  %606 = vmatprep.mubr.f32.mxu0 %v3799_v3  ;;  %v625_v6 = vld [vmem:[%s3791_s7] sm:$0xff]  ;;  %v3805_v12 = vmov 6   ;;  %v3801_v15 = vmov 8   ;;  %vm532_vm0 = vcmask 64512   ;;  %v530_v61 = vld [vmem:[%s3790_s6 + $0x8] sm:$0xff]  ;;  %s2437_s17 = smov 17  }
  0x10   : > { %612 = vmatprep.mubr.f32.mxu1 %v3799_v3  ;;  %670 = vperm.xlu1 %2336, %v626_v4   ;;  %s3906_s30 = smov (!%p458_p3, %s2278_s30), 1  ;;  %v529_v60 = vld [vmem:[%s3790_s6] sm:$0xff]  ;;  %s2438_s18 = smov 16   ;;  %vm2144_vm13 = vcmask 130048  }
  0x11   : > { %s3828_s23 = sshll.u32 %s3906_s30, 4  ;;  %s2439_s19 = smov 15  }
  0x12   : > { %s2566_s26 = scalar_lea.vmem %s3784_s0, %s3828_s23  ;;  %s2440_s20 = smov 1  }
  0x13   : > { %524 = vperm.xlu0 %2335, %v475_v2   ;;  %v469_v13 = vld [vmem:[%s2566_s26 + $0x8] sm:$0xff]  ;;  %v468_v14 = vld [vmem:[%s2566_s26] sm:$0xff]  ;;  %s2441_s21 = smov 127   ;;  %s2442_s22 = smov 113  }
  0x14   : > { %2337 = vset.pattern.permute.xlu1 %v3815_v7  ;;  %v482_v16 = vrot.slane %v469_v13, 4  ;;  %v476_v17 = vrot.slane %v468_v14, 4  ;;  %s2443_s24 = smov 112   ;;  %s3829_s25 = smov 111  }
  0x15   : > { %728 = vperm.xlu1 %2337, %v626_v4   ;;  %s3877_s23 = smov 111  }
  0x16   : > { %v483_v18 = vadd.f32 %v482_v16, %v469_v13  ;;  %v477_v19 = vadd.f32 %v476_v17, %v468_v14 }
  0x17   : > { %2338 = vset.pattern.permute.xlu0 %v3817_v5 }
  0x18   : > { %785 = vperm.xlu0 %2338, %v626_v4   ;;  %v484_v20 = vrot.slane %v483_v18, 2  ;;  %v478_v21 = vrot.slane %v477_v19, 2 }
  0x19   : > { %724 = vperm.xlu1 %2337, %v625_v6  }
  0x1a   : > { %v485_v22 = vadd.f32 %v484_v20, %v483_v18  ;;  %v479_v23 = vadd.f32 %v478_v21, %v477_v19 }
  0x1c   : > { %2341 = vset.pattern.permute.xlu0 %v3811_v8  ;;  %v486_v24 = vrot.slane %v485_v22, 1  ;;  %v480_v25 = vrot.slane %v479_v23, 1 }
  0x1d   : > { %838 = vperm.xlu0 %2341, %v625_v6   ;;  %2339 = vset.pattern.permute.xlu1 %v3817_v5 }
  0x1e   : > { %781 = vperm.xlu1 %2339, %v625_v6   ;;  %v487_v26 = vadd.f32 %v486_v24, %v485_v22  ;;  %v481_v27 = vadd.f32 %v480_v25, %v479_v23 }
  0x20   : > { %v490_v28 = vmul.f32 0.125, %v487_v26  ;;  %v489_v29 = vmul.f32 0.125, %v481_v27 }
  0x21   : > { %2342 = vset.pattern.permute.xlu0 %v3813_v9 }
  0x22   : > { %880 = vperm.xlu0 %2342, %v626_v4   ;;  %2340 = vset.pattern.permute.xlu1 %v3811_v8  ;;  %v492_v30 = vsub.f32 %v469_v13, %v490_v28  ;;  %v491_v31 = vsub.f32 %v468_v14, %v489_v29 }
  0x23   : > { %842 = vperm.xlu1 %2340, %v626_v4  }
  0x24   : > { %v494_v32 = vmul.f32 %v492_v30, %v492_v30  ;;  %v493_v33 = vmul.f32 %v491_v31, %v491_v31 }
  0x26   : > { %876 = vperm.xlu0 %2342, %v625_v6   ;;  %v501_v34 = vrot.slane %v494_v32, 4  ;;  %v495_v35 = vrot.slane %v493_v33, 4 }
  0x27   : > { %2343 = vset.pattern.permute.xlu1 %v3809_v10 }
  0x28   : > { %937 = vperm.xlu1 %2343, %v626_v4   ;;  %v502_v36 = vadd.f32 %v501_v34, %v494_v32  ;;  %v496_v37 = vadd.f32 %v495_v35, %v493_v33 }
  0x2a   : > { %2344 = vset.pattern.permute.xlu0 %v3809_v10  ;;  %v503_v38 = vrot.slane %v502_v36, 2  ;;  %v497_v39 = vrot.slane %v496_v37, 2 }
  0x2b   : > { %933 = vperm.xlu0 %2344, %v625_v6  }
  0x2c   : > { %2345 = vset.pattern.permute.xlu1 %v3805_v12  ;;  %v504_v40 = vadd.f32 %v503_v38, %v502_v36  ;;  %v498_v41 = vadd.f32 %v497_v39, %v496_v37 }
  0x2d   : > { %994 = vperm.xlu1 %2345, %v626_v4  }
  0x2e   : > { %v505_v42 = vrot.slane %v504_v40, 1  ;;  %v499_v43 = vrot.slane %v498_v41, 1 }
  0x2f   : > { %2346 = vset.pattern.permute.xlu0 %v3803_v11 }
  0x30   : > { %1051 = vperm.xlu0 %2346, %v626_v4   ;;  %v506_v44 = vadd.f32 %v505_v42, %v504_v40  ;;  %v500_v45 = vadd.f32 %v499_v43, %v498_v41  ;;  %v640_v41 = vlaneseq }
  0x31   : > { %990 = vperm.xlu1 %2345, %v625_v6  }
  0x32   : > { %v508_v46 = vmul.f32 0.125, %v506_v44  ;;  %v507_v47 = vmul.f32 0.125, %v500_v45  ;;  %v2710_v44 = vshrl.u32 %v640_v41, 7 }
  0x34   : > { %1047 = vperm.xlu0 %2346, %v625_v6   ;;  %v510_v48 = vadd.f32 1e-05, %v508_v46  ;;  %v509_v49 = vadd.f32 1e-05, %v507_v47  ;;  %v863_v47 = vsub.s32 4, %v2710_v44 }
  0x35   : > { %2347 = vset.pattern.permute.xlu1 %v3801_v15 }
  0x36   : > { %1108 = vperm.xlu1 %2347, %v626_v4   ;;  %2387 = vrsqrt.f32 %v510_v48  ;;  %v531_v4 = vld [vmem:[%s3790_s6 + $0x10] sm:$0xff]  ;;  %v2720_v48 = vld [vmem:[%s3785_s1] sm:$0xff] }
  0x37   : > { %2389 = vrsqrt.f32 %v509_v49  ;;  %v2725_v49 = vld [vmem:[%s3785_s1 + $0x8] sm:$0xff] }
  0x38   : > { %2348 = vset.pattern.permute.xlu0 %v3801_v15 }
  0x39   : > { %1104 = vperm.xlu0 %2348, %v625_v6  }
  0x3a   : > { %2350 = vset.pattern.permute.xlu1 %v3807_v1 }
  0x3d   : > { %2349 = vset.pattern.permute.xlu0 %v3807_v1 }
  0x3e   : > { %665 = vperm.xlu0 %2349, %v625_v6  }
  0x40   : > { %v2388_v50 = vpop.eup %2387 }
  0x41   : > { %v2390_v51 = vpop.eup %2389  ;;  %v514_v52 = vmul.f32 %v2388_v50, %v492_v30 }
  0x42   : > { %v513_v53 = vmul.f32 %v2390_v51, %v491_v31  ;;  %v2730_v51 = vrot.slane %v2720_v48, %v863_v47 }
  0x44   : > { %3848 = vst [vmem:[#allocation5_spill] sm:$0xff] %v2730_v51 }
  0x8e   : > { %v518_v54 = vpop.permute.xlu0 %517 }
  0x8f   : > { %v521_v55 = vmul.f32 %v518_v54, %v514_v52  ;;  %v520_v56 = vmul.f32 %v518_v54, %v513_v53  ;;  %v2656_v13 = vpop.permute.xlu1 %670  ;;  %v2733_v53 = vrot.slane %v2725_v49, %v863_v47 }
  0x91   : > { %3849 = vst [vmem:[#allocation6_spill] sm:$0xff] %v2733_v53 }
  0x92   : > { %v525_v57 = vpop.permute.xlu0 %524 }
  0x93   : > { %v528_v58 = vadd.f32 %v525_v57, %v521_v55  ;;  %v527_v59 = vadd.f32 %v525_v57, %v520_v56  ;;  %v2739_v57 = vand.u32 127, %v640_v41 }
  0x94   : > { %v2662_v16 = vpop.permute.xlu1 %728 }
  0x95   : > { %542 = vmatprep.subr.mxu0 %v528_v58  ;;  %2307 = vmatprep.subr.mxu1 %v528_v58  ;;  %v711_v58 = vsub.s32 1, %v2710_v44  ;;  %vm702_vm1 = vcmp.lt.s32.totalorder %v2739_v57, 16  ;;  %vm642_vm2 = vcmp.lt.s32.totalorder %v2739_v57, 17  ;;  %vm816_vm3 = vcmp.lt.s32.totalorder %v2739_v57, 1 }
  0x96   : > { %543 = vmatpush1.msra.mxu0 %v527_v59  ;;  %2308 = vmatpush1.msra.mxu1 %v527_v59  ;;  %vm759_vm4 = vcmp.lt.s32.totalorder %v2739_v57, 15  ;;  %vm968_vm5 = vcmp.lt.s32.totalorder %v2739_v57, 113  ;;  %vm911_vm6 = vcmp.lt.s32.totalorder %v2739_v57, 127  ;;  %vm1025_vm7 = vcmp.lt.s32.totalorder %v2739_v57, 112 }
  0x97   : > { %2287 = vmatmul.mubr.msk.f32.vlgmr.msra.gmra.mrb[0].mxu0 %vm532_vm0, %v529_v60  ;;  %2288 = vmatmul.mubr.msk.f32.vlgmr.msra.gmra.mrb[0].mxu1 %vm532_vm0, %v530_v61  ;;  %v2652_v6 = vpop.permute.xlu0 %785  ;;  %v651_v61 = vsub.s32 0, %v2710_v44  ;;  %vm1082_vm8 = vcmp.lt.s32.totalorder %v2739_v57, 111 }
  0x98   : > { %618 = vmatprep.mubr.f32.mxu1 %v3799_v3  ;;  %1534 = vmatprep.mubr.f32.mxu0 %v3799_v3  ;;  %v2668_v18 = vpop.permute.xlu1 %724 }
  0x99   : > { %v2770_v12 = vrot.slane %v2720_v48, %v651_v61 }
  0x9b   : > { %2289 = vmatmul.mubr.msk.f32.gmra.mrb[2].mxu1 %vm532_vm0, %v531_v4 }
  0x9c   : > { %v2660_v14 = vpop.permute.xlu0 %838 }
  0x9d   : > { %v2670_v20 = vpop.permute.xlu1 %781 }
  0xa1   : > { %v881_v17 = vpop.permute.xlu0 %880 }
  0xa2   : > { %v2674_v22 = vpop.permute.xlu1 %842 }
  0xa5   : > { %v877_v19 = vpop.permute.xlu0 %876 }
  0xa7   : > { %v2678_v24 = vpop.permute.xlu1 %937 }
  0xaa   : > { %v2672_v21 = vpop.permute.xlu0 %933 }
  0xac   : > { %v2682_v26 = vpop.permute.xlu1 %994 }
  0xaf   : > { %v2676_v23 = vpop.permute.xlu0 %1051 }
  0xb0   : > { %v2686_v28 = vpop.permute.xlu1 %990 }
  0xb3   : > { %v2680_v25 = vpop.permute.xlu0 %1047 }
  0xb4   : > { %3845 = vst [vmem:[#allocation2_spill] sm:$0xff] %v2680_v25 }
  0xb5   : > { %v2688_v29 = vpop.permute.xlu1 %1108 }
  0xb6   : > { %3847 = vst [vmem:[#allocation4_spill] sm:$0xff] %v2688_v29 }
  0xb8   : > { %v2684_v27 = vpop.permute.xlu0 %1104 }
  0xb9   : > { %3846 = vst [vmem:[#allocation3_spill] sm:$0xff] %v2684_v27 }
  0xbd   : > { %v2690_v30 = vpop.permute.xlu0 %665 }
 0x16a   : > { %v2584_v62 = vpop.f32.mrb[0].mxu0  ;;  %v2586_v63 = vpop.f32.mrb[0].mxu1 }
 0x16b   : > { %630 = vrot.lane.b32.xlu1 %v2586_v63, %s2437_s17  ;;  %v2590_v0 = vpop.f32.mrb[1].mxu1  ;;  %628 = vrot.lane.b32.xlu0 %v2584_v62, %s2437_s17  ;;  %v2594_v2 = vpop.f32.mrb[1].mxu0  ;;  %v871_v55 = vmul.f32 %v2730_v51, %v2586_v63  ;;  %v869_v56 = vmul.f32 %v2730_v51, %v2584_v62 }
 0x16c   : > { %v872_v59 = vmul.f32 %v2733_v53, %v2590_v0  ;;  %v870_v60 = vmul.f32 %v2733_v53, %v2594_v2 }
 0x16d   : > { %v2750_v3 = vmul.f32 %v877_v19, %v869_v56  ;;  %v768_v56 = vsub.s32 2, %v2710_v44 }
 0x16e   : > { %v2760_v41 = vmul.f32 %v881_v17, %v872_v59  ;;  %v2767_v11 = vmul.f32 %v877_v19, %v870_v60 }
 0x16f   : > { %692 = vrot.lane.b32.xlu1 %v2586_v63, %s2438_s18  ;;  %690 = vrot.lane.b32.xlu0 %v2584_v62, %s2438_s18  ;;  %v2792_v8 = vrot.slane %v2720_v48, %v768_v56 }
 0x173   : > { %749 = vrot.lane.b32.xlu1 %v2586_v63, %s2439_s19  ;;  %804 = vrot.lane.b32.xlu0 %v2584_v62, %s2440_s20 }
 0x177   : > { %747 = vrot.lane.b32.xlu1 %v2584_v62, %s2439_s19  ;;  %901 = vrot.lane.b32.xlu0 %v2586_v63, %s2441_s21 }
 0x17b   : > { %806 = vrot.lane.b32.xlu1 %v2586_v63, %s2440_s20  ;;  %956 = vrot.lane.b32.xlu0 %v2584_v62, %s2442_s22 }
 0x17f   : > { %899 = vrot.lane.b32.xlu1 %v2584_v62, %s2441_s21  ;;  %1013 = vrot.lane.b32.xlu0 %v2584_v62, %s2443_s24 }
 0x183   : > { %958 = vrot.lane.b32.xlu1 %v2586_v63, %s2442_s22  ;;  %636 = vrot.lane.b32.xlu0 %v2590_v0, %s2437_s17 }
 0x187   : > { %1015 = vrot.lane.b32.xlu1 %v2586_v63, %s2443_s24  ;;  %698 = vrot.lane.b32.xlu0 %v2590_v0, %s2438_s18 }
 0x18b   : > { %812 = vrot.lane.b32.xlu0 %v2590_v0, %s2440_s20  ;;  %634 = vrot.lane.b32.xlu1 %v2594_v2, %s2437_s17 }
 0x18f   : > { %964 = vrot.lane.b32.xlu0 %v2590_v0, %s2442_s22  ;;  %696 = vrot.lane.b32.xlu1 %v2594_v2, %s2438_s18 }
 0x193   : > { %1072 = vrot.lane.b32.xlu0 %v2586_v63, %s3829_s25  ;;  %755 = vrot.lane.b32.xlu1 %v2590_v0, %s2439_s19  ;;  %v2748_v63 = vmul.f32 %v881_v17, %v871_v55 }
 0x197   : > { %1070 = vrot.lane.b32.xlu0 %v2584_v62, %s3829_s25  ;;  %753 = vrot.lane.b32.xlu1 %v2594_v2, %s2439_s19  ;;  %v2754_v62 = vrot.slane %v2720_v48, %v711_v58 }
 0x19b   : > { %810 = vrot.lane.b32.xlu1 %v2594_v2, %s2440_s20 }
 0x19f   : > { %907 = vrot.lane.b32.xlu1 %v2590_v0, %s2441_s21 }
 0x1a3   : > { %905 = vrot.lane.b32.xlu1 %v2594_v2, %s2441_s21 }
 0x1a7   : > { %962 = vrot.lane.b32.xlu1 %v2594_v2, %s2442_s22 }
 0x1ab   : > { %1021 = vrot.lane.b32.xlu1 %v2590_v0, %s2443_s24 }
 0x1af   : > { %1019 = vrot.lane.b32.xlu1 %v2594_v2, %s2443_s24 }
 0x1b3   : > { %1078 = vrot.lane.b32.xlu1 %v2590_v0, %s3829_s25  ;;  %v2757_v0 = vrot.slane %v2725_v49, %v711_v58  ;;  %v2773_v58 = vrot.slane %v2725_v49, %v651_v61 }
 0x1b5   : > { %3850 = vst [vmem:[#allocation7_spill] sm:$0xff] %v2757_v0 }
 0x1b7   : > { %1076 = vrot.lane.b32.xlu1 %v2594_v2, %s3829_s25  ;;  %v825_v2 = vsub.s32 3, %v2710_v44 }
 0x1b9   : > { %v2785_v61 = vrot.slane %v2720_v48, %v825_v2  ;;  %v2789_v10 = vrot.slane %v2725_v49, %v825_v2 }
 0x1dd   : > { %v631_v31 = vpop.permute.xlu1 %630  ;;  %v2692_v32 = vpop.permute.xlu0 %628 }
 0x1e1   : > { %v693_v33 = vpop.permute.xlu1 %692  ;;  %v2694_v34 = vpop.permute.xlu0 %690 }
 0x1e5   : > { %v750_v35 = vpop.permute.xlu1 %749  ;;  %v2696_v36 = vpop.permute.xlu0 %804 }
 0x1e9   : > { %v2698_v37 = vpop.permute.xlu1 %747  ;;  %v2700_v38 = vpop.permute.xlu0 %901 }
 0x1ed   : > { %v2702_v39 = vpop.permute.xlu1 %806  ;;  %v2706_v42 = vpop.permute.xlu0 %956 }
 0x1f1   : > { %v2704_v40 = vpop.permute.xlu1 %899  ;;  %v2712_v45 = vpop.permute.xlu0 %1013 }
 0x1f5   : > { %v2708_v43 = vpop.permute.xlu1 %958  ;;  %v637_v52 = vpop.permute.xlu0 %636 }
 0x1f6   : > { %v644_v59 = vsel %vm642_vm2, %v631_v31, %v637_v52  ;;  %v647_v1 = vsel %vm642_vm2, %v637_v52, %v631_v31  ;;  %v2795_v31 = vrot.slane %v2725_v49, %v768_v56  ;;  %v1034_v52 = vsub.s32 7, %v2710_v44 }
 0x1f8   : > { %v2834_v29 = vrot.slane %v2725_v49, %v1034_v52 }
 0x1f9   : > { %v2714_v46 = vpop.permute.xlu1 %1015  ;;  %v699_v4 = vpop.permute.xlu0 %698 }
 0x1fa   : > { %v704_v15 = vsel %vm702_vm1, %v693_v33, %v699_v4  ;;  %v707_v55 = vsel %vm702_vm1, %v699_v4, %v693_v33  ;;  %v977_v33 = vsub.s32 6, %v2710_v44  ;;  %v920_v4 = vsub.s32 5, %v2710_v44 }
 0x1fb   : > { %v719_v19 = vmul.f32 %v2754_v62, %v707_v55  ;;  %v720_v60 = vmul.f32 %v2757_v0, %v704_v15  ;;  %v659_v55 = vmul.f32 %v2770_v12, %v647_v1  ;;  %v660_v15 = vmul.f32 %v2773_v58, %v644_v59 }
 0x1fc   : > { %v2806_v53 = vrot.slane %v2720_v48, %v977_v33  ;;  %v2809_v56 = vrot.slane %v2725_v49, %v977_v33  ;;  %v2815_v59 = vrot.slane %v2720_v48, %v920_v4 }
 0x1fd   : > { %v2727_v50 = vpop.permute.xlu1 %634  ;;  %v813_v5 = vpop.permute.xlu0 %812  ;;  %v737_v1 = vmul.f32 %v2662_v16, %v719_v19  ;;  %v738_v44 = vmul.f32 %v2662_v16, %v720_v60  ;;  %v680_v16 = vmul.f32 %v2656_v13, %v659_v55  ;;  %v681_v60 = vmul.f32 %v2656_v13, %v660_v15 }
 0x1fe   : > { %v818_v25 = vsel %vm816_vm3, %v2702_v39, %v813_v5  ;;  %v646_v13 = vsel %vm642_vm2, %v2727_v50, %v2692_v32 }
 0x1ff   : > { %v834_v15 = vmul.f32 %v2789_v10, %v818_v25 }
 0x201   : > { %v697_v54 = vpop.permute.xlu1 %696 }
 0x202   : > { %v706_v33 = vsel %vm702_vm1, %v697_v54, %v2694_v34 }
 0x205   : > { %v756_v47 = vpop.permute.xlu1 %755 }
 0x206   : > { %v761_v9 = vsel %vm759_vm4, %v750_v35, %v756_v47  ;;  %v764_v7 = vsel %vm759_vm4, %v756_v47, %v750_v35  ;;  %v2818_v35 = vrot.slane %v2725_v49, %v920_v4  ;;  %v703_v47 = vsel %vm702_vm1, %v2694_v34, %v697_v54 }
 0x207   : > { %v776_v51 = vmul.f32 %v2792_v8, %v764_v7  ;;  %v777_v19 = vmul.f32 %v2795_v31, %v761_v9  ;;  %v2831_v4 = vrot.slane %v2720_v48, %v1034_v52  ;;  %v821_v7 = vsel %vm816_vm3, %v813_v5, %v2702_v39  ;;  %v965_v52 = vpop.permute.xlu0 %964 }
 0x208   : > { %v643_v9 = vsel %vm642_vm2, %v2692_v32, %v2727_v50  ;;  %v717_v34 = vmul.f32 %v2754_v62, %v706_v33  ;;  %v718_v48 = vmul.f32 %v2757_v0, %v703_v47  ;;  %v743_v39 = vadd.f32 %v737_v1, %v680_v16 }
 0x209   : > { %v754_v17 = vpop.permute.xlu1 %753  ;;  %v744_v54 = vadd.f32 %v738_v44, %v681_v60  ;;  %v794_v55 = vmul.f32 %v2652_v6, %v776_v51  ;;  %v795_v32 = vmul.f32 %v2652_v6, %v777_v19  ;;  %v833_v50 = vmul.f32 %v2785_v61, %v821_v7 }
 0x20a   : > { %v760_v49 = vsel %vm759_vm4, %v2698_v37, %v754_v17  ;;  %v763_v5 = vsel %vm759_vm4, %v754_v17, %v2698_v37  ;;  %v657_v47 = vmul.f32 %v2770_v12, %v646_v13  ;;  %v658_v33 = vmul.f32 %v2773_v58, %v643_v9 }
 0x20b   : > { %v774_v37 = vmul.f32 %v2792_v8, %v763_v5  ;;  %v775_v17 = vmul.f32 %v2795_v31, %v760_v49  ;;  %v970_v25 = vsel %vm968_vm5, %v2708_v43, %v965_v52  ;;  %v973_v51 = vsel %vm968_vm5, %v965_v52, %v2708_v43 }
 0x20c   : > { %v735_v44 = vmul.f32 %v2668_v18, %v717_v34  ;;  %v736_v19 = vmul.f32 %v2668_v18, %v718_v48  ;;  %v800_v16 = vadd.f32 %v794_v55, %v743_v39  ;;  %v801_v60 = vadd.f32 %v795_v32, %v744_v54 }
 0x20d   : > { %v811_v2 = vpop.permute.xlu1 %810  ;;  %v852_v9 = vmul.f32 %v2674_v22, %v834_v15  ;;  %v678_v18 = vmul.f32 %v2690_v30, %v657_v47  ;;  %v679_v48 = vmul.f32 %v2690_v30, %v658_v33  ;;  %v792_v49 = vmul.f32 %v2670_v20, %v774_v37 }
 0x20e   : > { %v817_v1 = vsel %vm816_vm3, %v2696_v36, %v811_v2  ;;  %v820_v6 = vsel %vm816_vm3, %v811_v2, %v2696_v36  ;;  %v851_v2 = vmul.f32 %v2674_v22, %v833_v50  ;;  %v793_v5 = vmul.f32 %v2670_v20, %v775_v17 }
 0x20f   : > { %v831_v43 = vmul.f32 %v2785_v61, %v820_v6  ;;  %v832_v13 = vmul.f32 %v2789_v10, %v817_v1  ;;  %v985_v39 = vmul.f32 %v2806_v53, %v970_v25  ;;  %v741_v54 = vadd.f32 %v735_v44, %v678_v18 }
 0x210   : > { %v742_v52 = vadd.f32 %v736_v19, %v679_v48  ;;  %v857_v55 = vadd.f32 %v851_v2, %v800_v16  ;;  %v858_v32 = vadd.f32 %v852_v9, %v801_v60 }
 0x211   : > { %v908_v27 = vpop.permute.xlu1 %907  ;;  %v849_v30 = vmul.f32 %v2660_v14, %v831_v43  ;;  %v850_v50 = vmul.f32 %v2660_v14, %v832_v13  ;;  %v798_v33 = vadd.f32 %v792_v49, %v741_v54  ;;  %v1073_v43 = vpop.permute.xlu0 %1072 }
 0x212   : > { %v913_v7 = vsel %vm911_vm6, %v2700_v38, %v908_v27  ;;  %v916_v36 = vsel %vm911_vm6, %v908_v27, %v2700_v38  ;;  %v986_v27 = vmul.f32 %v2809_v56, %v973_v51  ;;  %v799_v37 = vadd.f32 %v793_v5, %v742_v52 }
 0x213   : > { %v928_v38 = vmul.f32 %v2815_v59, %v913_v7  ;;  %v929_v22 = vmul.f32 %v2818_v35, %v916_v36  ;;  %v896_v51 = vadd.f32 %v2760_v41, %v858_v32  ;;  %v855_v19 = vadd.f32 %v849_v30, %v798_v33 }
 0x214   : > { %v856_v16 = vadd.f32 %v850_v50, %v799_v37  ;;  %v1003_v41 = vmul.f32 %v2682_v26, %v985_v39  ;;  %v1004_v9 = vmul.f32 %v2682_v26, %v986_v27  ;;  %v2950_v26 = vld [vmem:[%s3785_s1 + $0x18] ss:$0 sm:$0xff] }
 0x215   : > { %v906_v0 = vpop.permute.xlu1 %905  ;;  %v946_v14 = vmul.f32 %v2678_v24, %v928_v38  ;;  %v947_v6 = vmul.f32 %v2678_v24, %v929_v22  ;;  %v2945_v38 = vld [vmem:[%s3785_s1 + $0x10] ss:$0 sm:$0xff]  ;;  %v1071_v37 = vpop.permute.xlu0 %1070 }
 0x216   : > { %v912_v20 = vsel %vm911_vm6, %v2704_v40, %v906_v0  ;;  %v915_v15 = vsel %vm911_vm6, %v906_v0, %v2704_v40  ;;  %v895_v0 = vadd.f32 %v2748_v63, %v857_v55  ;;  %v894_v39 = vadd.f32 %v2767_v11, %v856_v16 }
 0x217   : > { %v926_v44 = vmul.f32 %v2815_v59, %v912_v20 }
 0x218   : > { %v952_v13 = vadd.f32 %v946_v14, %v895_v0 }
 0x219   : > { %v963_v34 = vpop.permute.xlu1 %962  ;;  %v944_v18 = vmul.f32 %v2672_v21, %v926_v44 }
 0x21a   : > { %v969_v25 = vsel %vm968_vm5, %v2706_v42, %v963_v34  ;;  %v972_v40 = vsel %vm968_vm5, %v963_v34, %v2706_v42  ;;  %v953_v34 = vadd.f32 %v947_v6, %v896_v51  ;;  %v1009_v11 = vadd.f32 %v1003_v41, %v952_v13 }
 0x21b   : > { %v983_v36 = vmul.f32 %v2806_v53, %v969_v25  ;;  %v984_v2 = vmul.f32 %v2809_v56, %v972_v40 }
 0x21c   : > { %v1010_v50 = vadd.f32 %v1004_v9, %v953_v34 }
 0x21d   : > { %v1022_v47 = vpop.permute.xlu1 %1021  ;;  %v1001_v54 = vmul.f32 %v2686_v28, %v983_v36  ;;  %v1002_v52 = vmul.f32 %v2686_v28, %v984_v2  ;;  %v3852_v28 = vld [vmem:[#allocation4_spill] sm:$0xff]  ;;  %v3853_v36 = vld [vmem:[#allocation3_spill] sm:$0xff] }
 0x21e   : > { %v1027_v17 = vsel %vm1025_vm7, %v2714_v46, %v1022_v47  ;;  %v1030_v1 = vsel %vm1025_vm7, %v1022_v47, %v2714_v46  ;;  %v927_v46 = vmul.f32 %v2818_v35, %v915_v15 }
 0x21f   : > { %v1042_v24 = vmul.f32 %v2831_v4, %v1027_v17  ;;  %v1043_v60 = vmul.f32 %v2834_v29, %v1030_v1 }
 0x220   : > { %v945_v48 = vmul.f32 %v2672_v21, %v927_v46 }
 0x221   : > { %v1020_v7 = vpop.permute.xlu1 %1019  ;;  %v1060_v21 = vmul.f32 %v2676_v23, %v1042_v24  ;;  %v1061_v27 = vmul.f32 %v2676_v23, %v1043_v60  ;;  %v3851_v23 = vld [vmem:[#allocation2_spill] sm:$0xff] }
 0x222   : > { %v1026_v42 = vsel %vm1025_vm7, %v2712_v45, %v1020_v7  ;;  %v1029_v63 = vsel %vm1025_vm7, %v1020_v7, %v2712_v45  ;;  %v893_v45 = vadd.f32 %v2750_v3, %v855_v19  ;;  %v951_v15 = vadd.f32 %v945_v48, %v894_v39 }
 0x223   : > { %v1040_v49 = vmul.f32 %v2831_v4, %v1026_v42  ;;  %v1041_v5 = vmul.f32 %v2834_v29, %v1029_v63  ;;  %v1066_v6 = vadd.f32 %v1060_v21, %v1009_v11  ;;  %v1067_v25 = vadd.f32 %v1061_v27, %v1010_v50 }
 0x224   : > { %v950_v20 = vadd.f32 %v944_v18, %v893_v45  ;;  %v1008_v0 = vadd.f32 %v1002_v52, %v951_v15  ;;  %v627_v45 = vld [vmem:[%s3791_s7 + $0x10] sm:$0xff]  ;;  %v3855_v39 = vmov 1   ;;  %v3856_v21 = vmov 4  }
 0x225   : > { %v1079_v22 = vpop.permute.xlu1 %1078  ;;  %v1058_v47 = vmul.f32 %v3851_v23, %v1040_v49  ;;  %v1059_v33 = vmul.f32 %v3851_v23, %v1041_v5  ;;  %v1159_v49 = vld [vmem:[%s3789_s5] sm:$0xff]  ;;  %v3854_v5 = vmov 2   ;;  %v3857_v27 = vmov 3  }
 0x226   : > { %v1084_v55 = vsel %vm1082_vm8, %v1073_v43, %v1079_v22  ;;  %v1087_v32 = vsel %vm1082_vm8, %v1079_v22, %v1073_v43  ;;  %v1007_v40 = vadd.f32 %v1001_v54, %v950_v20  ;;  %v3858_v22 = vmov 5   ;;  %v3003_v54 = vpop.f32.mrb[2].mxu1 }
 0x227   : > { %v1099_v30 = vmul.f32 %v2945_v38, %v1084_v55  ;;  %v1100_v3 = vmul.f32 %v2950_v26, %v1087_v32  ;;  %v1065_v7 = vadd.f32 %v1059_v33, %v1008_v0  ;;  %v3007_v52 = vpop.f32.mrb[3].mxu1  ;;  %v3859_v55 = vmov 0  }
 0x228   : > { %v1064_v60 = vadd.f32 %v1058_v47, %v1007_v40  ;;  %v3860_v32 = vmov 6  }
 0x229   : > { %v1117_v17 = vmul.f32 %v3852_v28, %v1099_v30  ;;  %v1118_v1 = vmul.f32 %v3852_v28, %v1100_v3  ;;  %v1077_v14 = vpop.permute.xlu1 %1076  ;;  %v3861_v30 = vmov 7   ;;  %v3862_v3 = vmov 8  }
 0x22a   : > { %v1083_v51 = vsel %vm1082_vm8, %v1071_v37, %v1077_v14  ;;  %v1086_v44 = vsel %vm1082_vm8, %v1077_v14, %v1071_v37 }
 0x22b   : > { %v1097_v46 = vmul.f32 %v2945_v38, %v1083_v51  ;;  %v1098_v19 = vmul.f32 %v2950_v26, %v1086_v44  ;;  %v2974_v16 = vadd.f32 %v1117_v17, %v1066_v6  ;;  %v2976_v24 = vadd.f32 %v1118_v1, %v1067_v25 }
 0x22d   : > { %v1115_v2 = vmul.f32 %v3853_v36, %v1097_v46  ;;  %v1116_v42 = vmul.f32 %v3853_v36, %v1098_v19  ;;  %v1143_v63 = vmul.f32 %v2974_v16, %v2974_v16  ;;  %v1144_v41 = vmul.f32 %v2976_v24, %v2976_v24 }
 0x22f   : > { %v1145_v9 = vadd.f32 %v1144_v41, %v1143_v63  ;;  %v2984_v43 = vadd.f32 %v1115_v2, %v1064_v60  ;;  %v2986_v13 = vadd.f32 %v1116_v42, %v1065_v7  ;;  %v3863_v2 = vmov 0.0  }
 0x231   : > { %1146 = vadd.xlane.f32.xlu0 %v1145_v9  ;;  %v1127_v34 = vmul.f32 %v2984_v43, %v2984_v43  ;;  %v1128_v18 = vmul.f32 %v2986_v13, %v2986_v13 }
 0x233   : > { %v1129_v48 = vadd.f32 %v1128_v18, %v1127_v34 }
 0x235   : > { %1130 = vadd.xlane.f32.xlu1 %v1129_v48 }
 0x246   : > { %675 = vperm.xlu1 %2350, %v627_v45  }
 0x247   : > { %1162 = vperm.xlu0 %2349, %v1159_v49  }
 0x24a   : > { %2351 = vset.pattern.permute.xlu1 %v3855_v39 }
 0x24b   : > { %2352 = vset.pattern.permute.xlu0 %v3854_v5  ;;  %732 = vperm.xlu1 %2351, %v627_v45  }
 0x24c   : > { %789 = vperm.xlu0 %2352, %v627_v45  }
 0x24f   : > { %2353 = vset.pattern.permute.xlu1 %v3857_v27 }
 0x250   : > { %2354 = vset.pattern.permute.xlu0 %v3856_v21  ;;  %846 = vperm.xlu1 %2353, %v627_v45  }
 0x251   : > { %632 = vrot.lane.b32.xlu0 %v3003_v54, %s2437_s17 }
 0x254   : > { %2355 = vset.pattern.permute.xlu1 %v3858_v22 }
 0x255   : > { %808 = vrot.lane.b32.xlu1 %v3003_v54, %s2440_s20  ;;  %638 = vrot.lane.b32.xlu0 %v3007_v52, %s2437_s17 }
 0x259   : > { %941 = vperm.xlu1 %2355, %v627_v45   ;;  %694 = vrot.lane.b32.xlu0 %v3003_v54, %s2438_s18 }
 0x25d   : > { %2360 = vset.pattern.permute.xlu1 %v3859_v55  ;;  %700 = vrot.lane.b32.xlu0 %v3007_v52, %s2438_s18 }
 0x261   : > { %751 = vrot.lane.b32.xlu0 %v3003_v54, %s2439_s19 }
 0x265   : > { %757 = vrot.lane.b32.xlu0 %v3007_v52, %s2439_s19 }
 0x269   : > { %884 = vperm.xlu0 %2354, %v627_v45  }
 0x26d   : > { %814 = vrot.lane.b32.xlu0 %v3007_v52, %s2440_s20 }
 0x26e   : > { %2356 = vset.pattern.permute.xlu0 %v3860_v32 }
 0x271   : > { %998 = vperm.xlu0 %2356, %v627_v45  }
 0x275   : > { %2357 = vset.pattern.permute.xlu0 %v3861_v30 }
 0x276   : > { %1055 = vperm.xlu0 %2357, %v627_v45  }
 0x27a   : > { %2358 = vset.pattern.permute.xlu0 %v3862_v3 }
 0x27b   : > { %1112 = vperm.xlu0 %2358, %v627_v45  }
 0x27f   : > { %1074 = vrot.lane.b32.xlu0 %v3003_v54, %s3829_s25 }
 0x280   : > { %2359 = vset.pattern.permute.xlu0 %v3859_v55 }
 0x2be   : > { %v1147_v11 = vpop.xlane.xlu0 %1146 }
 0x2bf   : > { %2391 = vrsqrt.f32 %v1147_v11  ;;  %vm1150_vm9 = vcmp.eq.f32.partialorder %v1147_v11, inf  ;;  %v1153_v23 = vand.u32 2147483648, %v1147_v11  ;;  %vm1152_vm10 = vcmp.eq.f32.partialorder %v1147_v11, 0.0 }
 0x2c2   : > { %v1131_v50 = vpop.xlane.xlu1 %1130 }
 0x2c3   : > { %2393 = vrsqrt.f32 %v1131_v50  ;;  %vm1134_vm11 = vcmp.eq.f32.partialorder %v1131_v50, inf  ;;  %v1137_v1 = vand.u32 2147483648, %v1131_v50  ;;  %vm1136_vm12 = vcmp.eq.f32.partialorder %v1131_v50, 0.0 }
 0x2c6   : > { %v1163_v60 = vpop.permute.xlu0 %1162  ;;  %v676_v9 = vpop.permute.xlu1 %675 }
 0x2c9   : > { %v2392_v20 = vpop.eup %2391 }
 0x2ca   : > { %v1149_v15 = vmul.f32 %v2392_v20, %v1147_v11 }
 0x2cb   : > { %v790_v20 = vpop.permute.xlu0 %789 }
 0x2cc   : > { %v1151_v47 = vsel %vm1150_vm9, %v1147_v11, %v1149_v15 }
 0x2cd   : > { %v2394_v33 = vpop.eup %2393  ;;  %v1154_v37 = vsel %vm1152_vm10, %v1153_v23, %v1151_v47 }
 0x2ce   : > { %v1133_v28 = vmul.f32 %v2394_v33, %v1131_v50  ;;  %v1155_v17 = vmax.f32 %v1154_v37, 1e-12 }
 0x2cf   : > { %v633_v15 = vpop.permute.xlu0 %632 }
 0x2d0   : > { %v1135_v14 = vsel %vm1134_vm11, %v1131_v50, %v1133_v28  ;;  %2395 = vrcp.f32 %v1155_v17 }
 0x2d1   : > { %v1138_v6 = vsel %vm1136_vm12, %v1137_v1, %v1135_v14 }
 0x2d2   : > { %v1139_v25 = vmax.f32 %v1138_v6, 1e-12 }
 0x2d3   : > { %v639_v23 = vpop.permute.xlu0 %638 }
 0x2d4   : > { %2397 = vrcp.f32 %v1139_v25  ;;  %v645_v25 = vsel %vm642_vm2, %v633_v15, %v639_v23 }
 0x2d7   : > { %v695_v47 = vpop.permute.xlu0 %694 }
 0x2da   : > { %v2396_v40 = vpop.eup %2395 }
 0x2db   : > { %v1158_v0 = vmul.f32 %v2396_v40, %v2976_v24  ;;  %v1157_v51 = vmul.f32 %v2396_v40, %v2974_v16  ;;  %v1167_v24 = vld [vmem:[%s3786_s2] sm:$0xff]  ;;  %v701_v33 = vpop.permute.xlu0 %700  ;;  %v648_v40 = vsel %vm642_vm2, %v639_v23, %v633_v15 }
 0x2dd   : > { %1168 = vmatprep.subr.mxu1 %v1158_v0  ;;  %v705_v0 = vsel %vm702_vm1, %v695_v47, %v701_v33 }
 0x2de   : > { %v2398_v44 = vpop.eup %2397  ;;  %1169 = vmatpush1.xpose.msra.mxu1 %v1157_v51  ;;  %v708_v51 = vsel %vm702_vm1, %v701_v33, %v695_v47 }
 0x2df   : > { %v1141_v46 = vmul.f32 %v2398_v44, %v2984_v43  ;;  %v1142_v19 = vmul.f32 %v2398_v44, %v2986_v13  ;;  %v733_v43 = vpop.permute.xlu1 %732  ;;  %v752_v37 = vpop.permute.xlu0 %751  ;;  %v661_v44 = vmul.f32 %v2770_v12, %v648_v40 }
 0x2e1   : > { %v1165_v7 = vmul.f32 %v1163_v60, %v1141_v46  ;;  %v1166_v36 = vmul.f32 %v1163_v60, %v1142_v19  ;;  %v662_v46 = vmul.f32 %v2773_v58, %v645_v25  ;;  %v721_v19 = vmul.f32 %v2754_v62, %v708_v51  ;;  %v3864_v60 = vld [vmem:[#allocation7_spill] sm:$0xff]  ;;  %v3865_v51 = vld [vmem:[#allocation5_spill] sm:$0xff] }
 0x2e3   : > { %1232 = vmatprep.mubr.f32.mxu1 %v1166_v36  ;;  %v847_v13 = vpop.permute.xlu1 %846  ;;  %v758_v17 = vpop.permute.xlu0 %757 }
 0x2e4   : > { %1233 = vmatmul.mubr.f32.vlgmr.msra.gmra.mrb[4].mxu1 %v1165_v7  ;;  %v722_v7 = vmul.f32 %v3864_v60, %v705_v0 }
 0x2e5   : > { %1316 = vmatprep.mubr.f32.mxu1 %v3863_v2 }
 0x2e7   : > { %v809_v34 = vpop.permute.xlu1 %808 }
 0x2e8   : > { %v885_v14 = vpop.permute.xlu0 %884 }
 0x2eb   : > { %v3051_v18 = vpop.permute.xlu1 %941 }
 0x2ec   : > { %v815_v36 = vpop.permute.xlu0 %814 }
 0x2ed   : > { %v819_v23 = vsel %vm816_vm3, %v809_v34, %v815_v36  ;;  %v822_v47 = vsel %vm816_vm3, %v815_v36, %v809_v34 }
 0x2f0   : > { %v999_v15 = vpop.permute.xlu0 %998 }
 0x3b7   : > { %v1234_v42 = vpop.f32.mrb[4].mxu1 }
 0x3b8   : > { %v1235_v16 = vadd.f32 %v1234_v42, %v1167_v24  ;;  %v1236_v63 = vpop.f32.mrb[5].mxu1  ;;  %v762_v42 = vsel %vm759_vm4, %v752_v37, %v758_v17 }
 0x3b9   : > { %v682_v63 = vmul.f32 %v676_v9, %v661_v44  ;;  %v873_v44 = vmul.f32 %v3865_v51, %v3003_v54 }
 0x3ba   : > { %v1238_v41 = vsel %vm532_vm0, %v1235_v16, -inf }
 0x3bb   : > { %1239 = vmax.xlane.f32.xlu1 %v1238_v41  ;;  %v683_v41 = vmul.f32 %v676_v9, %v662_v46  ;;  %v835_v9 = vmul.f32 %v2785_v61, %v822_v47  ;;  %v3866_v46 = vld [vmem:[#allocation6_spill] sm:$0xff] }
 0x3cc   : > { %903 = vrot.lane.b32.xlu1 %v3003_v54, %s2441_s21 }
 0x3d0   : > { %909 = vrot.lane.b32.xlu1 %v3007_v52, %s2441_s21 }
 0x3d4   : > { %960 = vrot.lane.b32.xlu1 %v3003_v54, %s2442_s22 }
 0x3d8   : > { %966 = vrot.lane.b32.xlu1 %v3007_v52, %s2442_s22 }
 0x3dc   : > { %1017 = vrot.lane.b32.xlu1 %v3003_v54, %s2443_s24 }
 0x3e0   : > { %1023 = vrot.lane.b32.xlu1 %v3007_v52, %s2443_s24 }
 0x448   : > { %v1240_v48 = vpop.xlane.xlu1 %1239 }
 0x449   : > { %v1241_v49 = vsub.f32 %v1235_v16, %v1240_v48  ;;  %v765_v16 = vsel %vm759_vm4, %v758_v17, %v752_v37  ;;  %v739_v48 = vmul.f32 %v733_v43, %v721_v19  ;;  %v1056_v17 = vpop.permute.xlu0 %1055  ;;  %v874_v19 = vmul.f32 %v3866_v46, %v3007_v52 }
 0x44b   : > { %v1242_v45 = vmul.f32 1.442695, %v1241_v49  ;;  %v740_v49 = vmul.f32 %v733_v43, %v722_v7  ;;  %v745_v25 = vadd.f32 %v739_v48, %v682_v63  ;;  %v836_v43 = vmul.f32 %v2789_v10, %v819_v23 }
 0x44c   : > { %v904_v28 = vpop.permute.xlu1 %903 }
 0x44d   : > { %2399 = vpow2.f32 %v1242_v45  ;;  %v778_v45 = vmul.f32 %v2792_v8, %v765_v16  ;;  %v746_v40 = vadd.f32 %v740_v49, %v683_v41  ;;  %v854_v16 = vmul.f32 %v847_v13, %v836_v43  ;;  %v1113_v23 = vpop.permute.xlu0 %1112 }
 0x44e   : > { %v891_v49 = vmul.f32 %v885_v14, %v873_v44 }
 0x44f   : > { %v796_v0 = vmul.f32 %v790_v20, %v778_v45  ;;  %v892_v45 = vmul.f32 %v885_v14, %v874_v19 }
 0x450   : > { %v910_v1 = vpop.permute.xlu1 %909 }
 0x451   : > { %v914_v7 = vsel %vm911_vm6, %v904_v28, %v910_v1  ;;  %v917_v34 = vsel %vm911_vm6, %v910_v1, %v904_v28  ;;  %v802_v36 = vadd.f32 %v796_v0, %v745_v25  ;;  %v1075_v44 = vpop.permute.xlu0 %1074 }
 0x452   : > { %v930_v48 = vmul.f32 %v2815_v59, %v914_v7 }
 0x454   : > { %v961_v6 = vpop.permute.xlu1 %960 }
 0x457   : > { %v3053_v11 = vpop.eup %2399 }
 0x458   : > { %v1244_v50 = vsel %vm532_vm0, %v3053_v11, 0.0  ;;  %v967_v24 = vpop.permute.xlu1 %966 }
 0x459   : > { %1245 = vadd.xlane.f32.xlu1 %v1244_v50  ;;  %v779_v50 = vmul.f32 %v2795_v31, %v762_v42  ;;  %v971_v41 = vsel %vm968_vm5, %v961_v6, %v967_v24  ;;  %v974_v54 = vsel %vm968_vm5, %v967_v24, %v961_v6  ;;  %v948_v6 = vmul.f32 %v3051_v18, %v930_v48 }
 0x45a   : > { %v987_v47 = vmul.f32 %v2806_v53, %v971_v41  ;;  %v988_v25 = vmul.f32 %v2809_v56, %v974_v54 }
 0x45b   : > { %v797_v37 = vmul.f32 %v790_v20, %v779_v50  ;;  %v853_v20 = vmul.f32 %v847_v13, %v835_v9 }
 0x45c   : > { %v1018_v33 = vpop.permute.xlu1 %1017  ;;  %v1006_v43 = vmul.f32 %v999_v15, %v988_v25  ;;  %v3141_v25 = vld [vmem:[%s3796_s12 + $0x10] sm:$0xff] }
 0x45d   : > { %v803_v42 = vadd.f32 %v797_v37, %v746_v40  ;;  %v859_v13 = vadd.f32 %v853_v20, %v802_v36 }
 0x45f   : > { %v860_v50 = vadd.f32 %v854_v16, %v803_v42  ;;  %v897_v37 = vadd.f32 %v891_v49, %v859_v13  ;;  %v1559_v13 = vld [vmem:[%s3796_s12] sm:$0xff] }
 0x460   : > { %v1024_v63 = vpop.permute.xlu1 %1023 }
 0x461   : > { %v1028_v28 = vsel %vm1025_vm7, %v1018_v33, %v1024_v63  ;;  %v1031_v1 = vsel %vm1025_vm7, %v1024_v63, %v1018_v33  ;;  %v898_v9 = vadd.f32 %v892_v45, %v860_v50  ;;  %v1005_v33 = vmul.f32 %v999_v15, %v987_v47  ;;  %v1560_v47 = vld [vmem:[%s3796_s12 + $0x8] sm:$0xff] }
 0x462   : > { %v1044_v40 = vmul.f32 %v2831_v4, %v1028_v28  ;;  %v1045_v14 = vmul.f32 %v2834_v29, %v1031_v1  ;;  %v954_v19 = vadd.f32 %v948_v6, %v897_v37  ;;  %v1562_v6 = vld [vmem:[%s3796_s12 + $0x18] sm:$0xff] }
 0x464   : > { %v1063_v36 = vmul.f32 %v1056_v17, %v1045_v14  ;;  %v1011_v16 = vadd.f32 %v1005_v33, %v954_v19 }
 0x46a   : > { %1080 = vrot.lane.b32.xlu1 %v3007_v52, %s3829_s25  ;;  %v931_v52 = vmul.f32 %v2818_v35, %v917_v34  ;;  %v1062_v34 = vmul.f32 %v1056_v17, %v1044_v40  ;;  %v2416_v40 = vld [vmem:[%s2566_s26 + $0x8] sm:$0xff] }
 0x46c   : > { %v949_v24 = vmul.f32 %v3051_v18, %v931_v52  ;;  %v1068_v48 = vadd.f32 %v1062_v34, %v1011_v16 }
 0x46e   : > { %v955_v7 = vadd.f32 %v949_v24, %v898_v9 }
 0x470   : > { %v1012_v54 = vadd.f32 %v1006_v43, %v955_v7 }
 0x472   : > { %v1069_v52 = vadd.f32 %v1063_v36, %v1012_v54 }
 0x4e6   : > { %v1246_v0 = vpop.xlane.xlu1 %1245 }
 0x4e7   : > { %2401 = vrcp.f32 %v1246_v0 }
 0x4ea   : > { %v1081_v42 = vpop.permute.xlu1 %1080 }
 0x4eb   : > { %v1085_v20 = vsel %vm1082_vm8, %v1075_v44, %v1081_v42  ;;  %v1088_v18 = vsel %vm1082_vm8, %v1081_v42, %v1075_v44 }
 0x4ec   : > { %v1101_v63 = vmul.f32 %v2945_v38, %v1085_v20  ;;  %v1102_v41 = vmul.f32 %v2950_v26, %v1088_v18  ;;  %v1401_v38 = vld [vmem:[%s3794_s10] sm:$0xff] }
 0x4ed   : > { %v1400_v26 = vld [vmem:[%s3793_s9] sm:$0xff]  ;;  %1449 = vperm.xlu1 %2360, %v1401_v38  }
 0x4ee   : > { %v1119_v15 = vmul.f32 %v1113_v23, %v1101_v63  ;;  %v1120_v49 = vmul.f32 %v1113_v23, %v1102_v41  ;;  %1442 = vperm.xlu0 %2359, %v1400_v26   ;;  %v1323_v23 = vld [vmem:[%s3792_s8] sm:$0xff] }
 0x4f0   : > { %v1126_v45 = vadd.f32 %v1120_v49, %v1069_v52  ;;  %v1125_v28 = vadd.f32 %v1119_v15, %v1068_v48 }
 0x4f1   : > { %v2402_v17 = vpop.eup %2401  ;;  %1597 = vperm.xlu1 %2360, %v1559_v13  }
 0x4f2   : > { %1252 = vmatprep.subr.mxu1 %v1126_v45  ;;  %v1248_v1 = vmul.f32 %v2402_v17, %v3053_v11  ;;  %2367 = vset.pattern.permute.xlu0 %v3860_v32 }
 0x4f3   : > { %1253 = vmatpush1.msra.mxu1 %v1125_v28  ;;  %1964 = vperm.xlu0 %2367, %v1560_v47  }
 0x4f4   : > { %2292 = vmatmul.mubr.msk.f32.vlgmr.msra.gmra.mrb[6].mxu1 %vm532_vm0, %v1248_v1 }
 0x4f5   : > { %1391 = vmatprep.mubr.f32.mxu1 %v3863_v2  ;;  %2361 = vset.pattern.permute.xlu1 %v3855_v39 }
 0x4f6   : > { %1664 = vperm.xlu1 %2361, %v1559_v13  }
 0x4f7   : > { %2368 = vset.pattern.permute.xlu0 %v3859_v55 }
 0x4f8   : > { %1602 = vperm.xlu0 %2368, %v1560_v47  }
 0x4fa   : > { %2362 = vset.pattern.permute.xlu1 %v3854_v5 }
 0x4fb   : > { %1728 = vperm.xlu1 %2362, %v1559_v13  }
 0x4fc   : > { %1607 = vperm.xlu0 %2368, %v3141_v25  }
 0x4ff   : > { %1732 = vperm.xlu1 %2362, %v1560_v47  }
 0x500   : > { %2371 = vset.pattern.permute.xlu0 %v3855_v39 }
 0x501   : > { %1668 = vperm.xlu0 %2371, %v1560_v47  }
 0x503   : > { %2363 = vset.pattern.permute.xlu1 %v3857_v27 }
 0x504   : > { %1796 = vperm.xlu1 %2363, %v1560_v47  }
 0x505   : > { %1676 = vperm.xlu0 %2371, %v1562_v6  }
 0x508   : > { %2364 = vset.pattern.permute.xlu1 %v3856_v21 }
 0x509   : > { %1832 = vperm.xlu1 %2364, %v1559_v13   ;;  %2374 = vset.pattern.permute.xlu0 %v3854_v5 }
 0x50a   : > { %1736 = vperm.xlu0 %2374, %v3141_v25  }
 0x50d   : > { %2365 = vset.pattern.permute.xlu1 %v3858_v22 }
 0x50e   : > { %1900 = vperm.xlu1 %2365, %v1560_v47   ;;  %2375 = vset.pattern.permute.xlu0 %v3857_v27 }
 0x50f   : > { %1792 = vperm.xlu0 %2375, %v1559_v13  }
 0x512   : > { %2366 = vset.pattern.permute.xlu1 %v3860_v32 }
 0x513   : > { %1960 = vperm.xlu1 %2366, %v1559_v13   ;;  %1804 = vperm.xlu0 %2375, %v1562_v6  }
 0x517   : > { %2369 = vset.pattern.permute.xlu1 %v3861_v30  ;;  %2378 = vset.pattern.permute.xlu0 %v3856_v21 }
 0x518   : > { %2028 = vperm.xlu1 %2369, %v1560_v47   ;;  %1836 = vperm.xlu0 %2378, %v1560_v47  }
 0x51c   : > { %2370 = vset.pattern.permute.xlu1 %v3862_v3  ;;  %1840 = vperm.xlu0 %2378, %v3141_v25  }
 0x51d   : > { %2088 = vperm.xlu1 %2370, %v1559_v13  }
 0x520   : > { %2379 = vset.pattern.permute.xlu0 %v3858_v22 }
 0x521   : > { %2372 = vset.pattern.permute.xlu1 %v3859_v55  ;;  %1896 = vperm.xlu0 %2379, %v1559_v13   ;;  %v2415_v55 = vld [vmem:[%s2566_s26] sm:$0xff] }
 0x522   : > { %1612 = vperm.xlu1 %2372, %v1562_v6  }
 0x525   : > { %1908 = vperm.xlu0 %2379, %v1562_v6  }
 0x526   : > { %2373 = vset.pattern.permute.xlu1 %v3855_v39 }
 0x527   : > { %1672 = vperm.xlu1 %2373, %v3141_v25  }
 0x529   : > { %2382 = vset.pattern.permute.xlu0 %v3861_v30 }
 0x52a   : > { %2024 = vperm.xlu0 %2382, %v1559_v13  }
 0x52b   : > { %2376 = vset.pattern.permute.xlu1 %v3854_v5 }
 0x52c   : > { %1740 = vperm.xlu1 %2376, %v1562_v6  }
 0x52e   : > { %2032 = vperm.xlu0 %2382, %v3141_v25  }
 0x530   : > { %2377 = vset.pattern.permute.xlu1 %v3857_v27 }
 0x531   : > { %1800 = vperm.xlu1 %2377, %v3141_v25  }
 0x532   : > { %2384 = vset.pattern.permute.xlu0 %v3862_v3 }
 0x533   : > { %2092 = vperm.xlu0 %2384, %v1560_v47  }
 0x535   : > { %2380 = vset.pattern.permute.xlu1 %v3856_v21 }
 0x536   : > { %1844 = vperm.xlu1 %2380, %v1562_v6  }
 0x537   : > { %2100 = vperm.xlu0 %2384, %v1562_v6  }
 0x53a   : > { %2381 = vset.pattern.permute.xlu1 %v3858_v22 }
 0x53b   : > { %1904 = vperm.xlu1 %2381, %v3141_v25  }
 0x53f   : > { %2383 = vset.pattern.permute.xlu1 %v3860_v32 }
 0x540   : > { %1968 = vperm.xlu1 %2383, %v3141_v25  }
 0x544   : > { %1972 = vperm.xlu1 %2383, %v1562_v6  }
 0x548   : > { %2385 = vset.pattern.permute.xlu1 %v3861_v30 }
 0x549   : > { %2036 = vperm.xlu1 %2385, %v1562_v6  }
 0x54d   : > { %2386 = vset.pattern.permute.xlu1 %v3862_v3 }
 0x54e   : > { %2096 = vperm.xlu1 %2386, %v3141_v25  }
 0x5c7   : > { %v1318_v11 = vpop.f32.mrb[6].mxu1 }
 0x5c8   : > { %v1320_v50 = vpop.f32.mrb[7].mxu1 }
 0x5c9   : > { %1327 = vmatprep.subr.mxu1 %v1320_v50  ;;  %v1443_v50 = vpop.permute.xlu0 %1442 }
 0x5ca   : > { %1328 = vmatpush1.msra.mxu1 %v1318_v11 }
 0x5cb   : > { %2293 = vmatmul.mubr.msk.f32.vlgmr.msra.gmra.mrb[8].mxu1 %vm532_vm0, %v1323_v23 }
 0x5cc   : > { %2212 = vmatprep.mubr.f32.mxu1 %v3863_v2 }
 0x69e   : > { %v1393_v39 = vpop.f32.mrb[8].mxu1 }
 0x69f   : > { %v3168_v24 = vadd.f32 %v2415_v55, %v1393_v39  ;;  %v1395_v5 = vpop.f32.mrb[9].mxu1  ;;  %v1450_v55 = vpop.permute.xlu1 %1449 }
 0x6a0   : > { %v3173_v27 = vadd.f32 %v2416_v40, %v1395_v5 }
 0x6a1   : > { %3867 = vst [vmem:[#allocation2_spill] sm:$0xff] %v3168_v24  ;;  %v1402_v21 = vrot.slane %v3168_v24, 4 }
 0x6a2   : > { %3868 = vst [vmem:[#allocation4_spill] sm:$0xff] %v3173_v27  ;;  %v1408_v14 = vrot.slane %v3173_v27, 4 }
 0x6a3   : > { %v1403_v0 = vadd.f32 %v1402_v21, %v3168_v24  ;;  %v1454_v21 = vld [vmem:[%s3795_s11] sm:$0xff] }
 0x6a4   : > { %v1409_v37 = vadd.f32 %v1408_v14, %v3173_v27  ;;  %v1455_v14 = vld [vmem:[%s3795_s11 + $0x8] sm:$0xff] }
 0x6a5   : > { %v1404_v22 = vrot.slane %v1403_v0, 2 }
 0x6a6   : > { %v1410_v9 = vrot.slane %v1409_v37, 2 }
 0x6a7   : > { %v1405_v33 = vadd.f32 %v1404_v22, %v1403_v0  ;;  %v1456_v0 = vld [vmem:[%s3795_s11 + $0x10] sm:$0xff]  ;;  %v3207_v22 = vpop.permute.xlu1 %1597 }
 0x6a8   : > { %v1411_v43 = vadd.f32 %v1410_v9, %v1409_v37  ;;  %v1457_v37 = vld [vmem:[%s3795_s11 + $0x18] sm:$0xff] }
 0x6a9   : > { %v1406_v44 = vrot.slane %v1405_v33, 1 }
 0x6aa   : > { %v1412_v19 = vrot.slane %v1411_v43, 1 }
 0x6ab   : > { %v1407_v7 = vadd.f32 %v1406_v44, %v1405_v33  ;;  %v3209_v9 = vpop.permute.xlu1 %1664 }
 0x6ac   : > { %v1413_v34 = vadd.f32 %v1412_v19, %v1411_v43  ;;  %v3217_v19 = vpop.permute.xlu0 %1964 }
 0x6ad   : > { %v1414_v36 = vmul.f32 0.125, %v1407_v7 }
 0x6ae   : > { %v1415_v42 = vmul.f32 0.125, %v1413_v34 }
 0x6af   : > { %v1416_v32 = vsub.f32 %v3168_v24, %v1414_v36  ;;  %v3211_v33 = vpop.permute.xlu1 %1728 }
 0x6b0   : > { %v1417_v20 = vsub.f32 %v3173_v27, %v1415_v42 }
 0x6b1   : > { %v1418_v18 = vmul.f32 %v1416_v32, %v1416_v32 }
 0x6b2   : > { %v1419_v16 = vmul.f32 %v1417_v20, %v1417_v20 }
 0x6b3   : > { %v1420_v63 = vrot.slane %v1418_v18, 4  ;;  %v3213_v43 = vpop.permute.xlu1 %1732 }
 0x6b4   : > { %v1426_v41 = vrot.slane %v1419_v16, 4 }
 0x6b5   : > { %v1421_v54 = vadd.f32 %v1420_v63, %v1418_v18 }
 0x6b6   : > { %v1427_v48 = vadd.f32 %v1426_v41, %v1419_v16 }
 0x6b7   : > { %v1422_v15 = vrot.slane %v1421_v54, 2  ;;  %v3215_v44 = vpop.permute.xlu1 %1796 }
 0x6b8   : > { %v1428_v52 = vrot.slane %v1427_v48, 2 }
 0x6b9   : > { %v1423_v49 = vadd.f32 %v1422_v15, %v1421_v54 }
 0x6ba   : > { %v1429_v30 = vadd.f32 %v1428_v52, %v1427_v48 }
 0x6bb   : > { %v1424_v45 = vrot.slane %v1423_v49, 1  ;;  %v3219_v7 = vpop.permute.xlu1 %1832 }
 0x6bc   : > { %v1430_v28 = vrot.slane %v1429_v30, 1 }
 0x6bd   : > { %v1425_v17 = vadd.f32 %v1424_v45, %v1423_v49 }
 0x6be   : > { %v1431_v1 = vadd.f32 %v1430_v28, %v1429_v30 }
 0x6bf   : > { %v1432_v38 = vmul.f32 0.125, %v1425_v17  ;;  %v3223_v34 = vpop.permute.xlu1 %1900 }
 0x6c0   : > { %v1433_v26 = vmul.f32 0.125, %v1431_v1 }
 0x6c1   : > { %v1434_v13 = vadd.f32 1e-05, %v1432_v38 }
 0x6c2   : > { %v1435_v11 = vadd.f32 1e-05, %v1433_v26 }
 0x6c3   : > { %2403 = vrsqrt.f32 %v1434_v13  ;;  %v3227_v42 = vpop.permute.xlu1 %1960 }
 0x6c4   : > { %2405 = vrsqrt.f32 %v1435_v11 }
 0x6cd   : > { %v2404_v3 = vpop.eup %2403 }
 0x6ce   : > { %v2406_v23 = vpop.eup %2405  ;;  %v1438_v47 = vmul.f32 %v2404_v3, %v1416_v32 }
 0x6cf   : > { %v1439_v25 = vmul.f32 %v2406_v23, %v1417_v20  ;;  %v3231_v20 = vpop.permute.xlu1 %2028 }
 0x6d0   : > { %v1445_v6 = vmul.f32 %v1443_v50, %v1438_v47 }
 0x6d1   : > { %v1446_v39 = vmul.f32 %v1443_v50, %v1439_v25 }
 0x6d2   : > { %v1452_v40 = vadd.f32 %v1450_v55, %v1445_v6 }
 0x6d3   : > { %v1453_v5 = vadd.f32 %v1450_v55, %v1446_v39  ;;  %v3235_v16 = vpop.permute.xlu1 %2088 }
 0x6d5   : > { %1470 = vmatprep.subr.mxu0 %v1453_v5 }
 0x6d6   : > { %1471 = vmatpush1.msra.mxu0 %v1452_v40 }
 0x6d7   : > { %2294 = vmatmul.mubr.msk.f32.vlgmr.msra.gmra.mrb[2].mxu0 %vm532_vm0, %v1454_v21  ;;  %v3239_v41 = vpop.permute.xlu1 %1612 }
 0x6d8   : > { %1540 = vmatprep.mubr.f32.mxu0 %v3863_v2  ;;  %3870 = vst [vmem:[#allocation7_spill] sm:$0xff] %v3239_v41 }
 0x6db   : > { %2295 = vmatmul.mubr.msk.f32.gmra.mrb[4].mxu0 %vm532_vm0, %v1455_v14  ;;  %v3243_v48 = vpop.permute.xlu1 %1672 }
 0x6dc   : > { %1546 = vmatprep.mubr.f32.mxu0 %v3863_v2 }
 0x6df   : > { %2296 = vmatmul.mubr.msk.f32.gmra.mrb[6].mxu0 %vm532_vm0, %v1456_v0  ;;  %v3255_v30 = vpop.permute.xlu1 %1740 }
 0x6e0   : > { %1552 = vmatprep.mubr.f32.mxu0 %v3863_v2  ;;  %v3221_v2 = vpop.permute.xlu0 %1602  ;;  %3872 = vst [vmem:[#allocation6_spill] sm:$0xff] %v3255_v30 }
 0x6e3   : > { %2297 = vmatmul.mubr.msk.f32.gmra.mrb[8].mxu0 %vm532_vm0, %v1457_v37  ;;  %v3265_v13 = vpop.permute.xlu1 %1800 }
 0x6e4   : > { %v3225_v36 = vpop.permute.xlu0 %1607 }
 0x6e7   : > { %v1845_v14 = vpop.permute.xlu1 %1844 }
 0x6e8   : > { %v3229_v32 = vpop.permute.xlu0 %1668 }
 0x6ec   : > { %v3233_v18 = vpop.permute.xlu0 %1676 }
 0x6ed   : > { %3869 = vst [vmem:[#allocation3_spill] sm:$0xff] %v3233_v18 }
 0x6f0   : > { %v3237_v63 = vpop.permute.xlu0 %1736 }
 0x6f4   : > { %v3241_v54 = vpop.permute.xlu0 %1792 }
 0x6f8   : > { %v3245_v15 = vpop.permute.xlu0 %1804 }
 0x6f9   : > { %3871 = vst [vmem:[#allocation5_spill] sm:$0xff] %v3245_v15 }
 0x6fc   : > { %v1837_v28 = vpop.permute.xlu0 %1836 }
 0x700   : > { %v1841_v50 = vpop.permute.xlu0 %1840 }
 0x7aa   : > { %v3247_v52 = vpop.f32.mrb[2].mxu0 }
 0x7ab   : > { %1695 = vrot.lane.b32.xlu1 %v3247_v52, %s2439_s19  ;;  %1563 = vrot.lane.b32.xlu0 %v3247_v52, %s2437_s17  ;;  %v3253_v49 = vpop.f32.mrb[3].mxu0 }
 0x7ae   : > { %v1542_v45 = vpop.f32.mrb[4].mxu0 }
 0x7af   : > { %1759 = vrot.lane.b32.xlu1 %v3247_v52, %s2440_s20  ;;  %1631 = vrot.lane.b32.xlu0 %v3247_v52, %s2438_s18  ;;  %v1544_v17 = vpop.f32.mrb[5].mxu0  ;;  %v1825_v1 = vmul.f32 %v1542_v45, %v3865_v51 }
 0x7b0   : > { %v1826_v38 = vmul.f32 %v1544_v17, %v3866_v46 }
 0x7b1   : > { %v3263_v26 = vmul.f32 %v1837_v28, %v1825_v1 }
 0x7b2   : > { %v3267_v11 = vmul.f32 %v1837_v28, %v1826_v38  ;;  %v3269_v3 = vpop.f32.mrb[6].mxu0 }
 0x7b3   : > { %1863 = vrot.lane.b32.xlu1 %v3247_v52, %s2441_s21  ;;  %1571 = vrot.lane.b32.xlu0 %v3253_v49, %s2437_s17  ;;  %v3275_v23 = vpop.f32.mrb[7].mxu0  ;;  %v1827_v47 = vmul.f32 %v3269_v3, %v3865_v51 }
 0x7b4   : > { %v1828_v25 = vmul.f32 %v3275_v23, %v3866_v46 }
 0x7b5   : > { %v3281_v6 = vmul.f32 %v1841_v50, %v1827_v47 }
 0x7b6   : > { %v3283_v39 = vpop.f32.mrb[8].mxu0  ;;  %v3285_v55 = vmul.f32 %v1841_v50, %v1828_v25 }
 0x7b7   : > { %3873 = vst [vmem:[#allocation8_spill] sm:$0xff] %v3281_v6  ;;  %1927 = vrot.lane.b32.xlu1 %v3247_v52, %s2442_s22  ;;  %1639 = vrot.lane.b32.xlu0 %v3253_v49, %s2438_s18  ;;  %v3291_v5 = vpop.f32.mrb[9].mxu0  ;;  %v1829_v40 = vmul.f32 %v3283_v39, %v3865_v51 }
 0x7b8   : > { %3874 = vst [vmem:[#allocation9_spill] sm:$0xff] %v3285_v55  ;;  %v1830_v21 = vmul.f32 %v3291_v5, %v3866_v46 }
 0x7b9   : > { %v3297_v0 = vmul.f32 %v1845_v14, %v1829_v40 }
 0x7ba   : > { %v3299_v37 = vmul.f32 %v1845_v14, %v1830_v21 }
 0x7bb   : > { %3875 = vst [vmem:[#allocation10_spill] sm:$0xff] %v3297_v0  ;;  %1991 = vrot.lane.b32.xlu1 %v3247_v52, %s2443_s24  ;;  %1767 = vrot.lane.b32.xlu0 %v3253_v49, %s2440_s20 }
 0x7bc   : > { %3876 = vst [vmem:[#allocation11_spill] sm:$0xff] %v3299_v37 }
 0x7bf   : > { %2055 = vrot.lane.b32.xlu1 %v3247_v52, %s3877_s23  ;;  %1871 = vrot.lane.b32.xlu0 %v3253_v49, %s2441_s21 }
 0x7c3   : > { %1703 = vrot.lane.b32.xlu1 %v3253_v49, %s2439_s19  ;;  %1999 = vrot.lane.b32.xlu0 %v3253_v49, %s2443_s24 }
 0x7c7   : > { %1935 = vrot.lane.b32.xlu1 %v3253_v49, %s2442_s22  ;;  %2063 = vrot.lane.b32.xlu0 %v3253_v49, %s3877_s23 }
 0x7cb   : > { %1697 = vrot.lane.b32.xlu0 %v1542_v45, %s2439_s19  ;;  %1565 = vrot.lane.b32.xlu1 %v1542_v45, %s2437_s17 }
 0x7cf   : > { %1929 = vrot.lane.b32.xlu0 %v1542_v45, %s2442_s22  ;;  %1633 = vrot.lane.b32.xlu1 %v1542_v45, %s2438_s18 }
 0x7d3   : > { %1761 = vrot.lane.b32.xlu1 %v1542_v45, %s2440_s20  ;;  %1705 = vrot.lane.b32.xlu0 %v1544_v17, %s2439_s19 }
 0x7d7   : > { %1865 = vrot.lane.b32.xlu1 %v1542_v45, %s2441_s21  ;;  %1937 = vrot.lane.b32.xlu0 %v1544_v17, %s2442_s22 }
 0x7db   : > { %1993 = vrot.lane.b32.xlu1 %v1542_v45, %s2443_s24  ;;  %1867 = vrot.lane.b32.xlu0 %v3269_v3, %s2441_s21 }
 0x7df   : > { %2057 = vrot.lane.b32.xlu1 %v1542_v45, %s3877_s23  ;;  %1707 = vrot.lane.b32.xlu0 %v3275_v23, %s2439_s19  ;;  %v3349_v45 = vpop.permute.xlu0 %1896 }
 0x7e3   : > { %1573 = vrot.lane.b32.xlu1 %v1544_v17, %s2437_s17  ;;  %1875 = vrot.lane.b32.xlu0 %v3275_v23, %s2441_s21  ;;  %v3359_v28 = vpop.permute.xlu0 %1908 }
 0x7e4   : > { %3878 = vst [vmem:[#allocation12_spill] sm:$0xff] %v3359_v28 }
 0x7e7   : > { %1641 = vrot.lane.b32.xlu1 %v1544_v17, %s2438_s18  ;;  %2003 = vrot.lane.b32.xlu0 %v3275_v23, %s2443_s24  ;;  %v3367_v1 = vpop.permute.xlu0 %2024 }
 0x7eb   : > { %1769 = vrot.lane.b32.xlu1 %v1544_v17, %s2440_s20  ;;  %1569 = vrot.lane.b32.xlu0 %v3283_v39, %s2437_s17  ;;  %v3379_v50 = vpop.permute.xlu0 %2032 }
 0x7ec   : > { %3881 = vst [vmem:[#allocation15_spill] sm:$0xff] %v3379_v50 }
 0x7ef   : > { %1873 = vrot.lane.b32.xlu1 %v1544_v17, %s2441_s21  ;;  %1637 = vrot.lane.b32.xlu0 %v3283_v39, %s2438_s18  ;;  %v3387_v25 = vpop.permute.xlu0 %2092 }
 0x7f3   : > { %2001 = vrot.lane.b32.xlu1 %v1544_v17, %s2443_s24  ;;  %1765 = vrot.lane.b32.xlu0 %v3283_v39, %s2440_s20  ;;  %v3395_v21 = vpop.permute.xlu0 %2100 }
 0x7f4   : > { %3884 = vst [vmem:[#allocation18_spill] sm:$0xff] %v3395_v21 }
 0x7f7   : > { %2065 = vrot.lane.b32.xlu1 %v1544_v17, %s3877_s23  ;;  %1933 = vrot.lane.b32.xlu0 %v3283_v39, %s2442_s22  ;;  %v3361_v17 = vpop.permute.xlu1 %1904 }
 0x7f8   : > { %3879 = vst [vmem:[#allocation13_spill] sm:$0xff] %v3361_v17 }
 0x7fb   : > { %1567 = vrot.lane.b32.xlu1 %v3269_v3, %s2437_s17  ;;  %1577 = vrot.lane.b32.xlu0 %v3291_v5, %s2437_s17  ;;  %v3373_v38 = vpop.permute.xlu1 %1968 }
 0x7fc   : > { %3880 = vst [vmem:[#allocation14_spill] sm:$0xff] %v3373_v38 }
 0x7ff   : > { %1635 = vrot.lane.b32.xlu1 %v3269_v3, %s2438_s18  ;;  %1645 = vrot.lane.b32.xlu0 %v3291_v5, %s2438_s18  ;;  %v3381_v47 = vpop.permute.xlu1 %1972 }
 0x800   : > { %3882 = vst [vmem:[#allocation16_spill] sm:$0xff] %v3381_v47 }
 0x803   : > { %1699 = vrot.lane.b32.xlu1 %v3269_v3, %s2439_s19  ;;  %1773 = vrot.lane.b32.xlu0 %v3291_v5, %s2440_s20  ;;  %v3389_v40 = vpop.permute.xlu1 %2036 }
 0x804   : > { %3883 = vst [vmem:[#allocation17_spill] sm:$0xff] %v3389_v40 }
 0x807   : > { %1763 = vrot.lane.b32.xlu1 %v3269_v3, %s2440_s20  ;;  %2059 = vrot.lane.b32.xlu0 %v3269_v3, %s3877_s23  ;;  %v3397_v14 = vpop.permute.xlu1 %2096 }
 0x808   : > { %3885 = vst [vmem:[#allocation19_spill] sm:$0xff] %v3397_v14 }
 0x80b   : > { %1931 = vrot.lane.b32.xlu1 %v3269_v3, %s2442_s22  ;;  %1941 = vrot.lane.b32.xlu0 %v3291_v5, %s2442_s22 }
 0x80f   : > { %1995 = vrot.lane.b32.xlu1 %v3269_v3, %s2443_s24  ;;  %2067 = vrot.lane.b32.xlu0 %v3275_v23, %s3877_s23 }
 0x813   : > { %1575 = vrot.lane.b32.xlu1 %v3275_v23, %s2437_s17 }
 0x817   : > { %1643 = vrot.lane.b32.xlu1 %v3275_v23, %s2438_s18 }
 0x81b   : > { %1771 = vrot.lane.b32.xlu1 %v3275_v23, %s2440_s20 }
 0x81d   : > { %v1564_v3 = vpop.permute.xlu0 %1563  ;;  %v1696_v27 = vpop.permute.xlu1 %1695 }
 0x81f   : > { %1939 = vrot.lane.b32.xlu1 %v3275_v23, %s2442_s22 }
 0x821   : > { %v1632_v24 = vpop.permute.xlu0 %1631  ;;  %v1760_v40 = vpop.permute.xlu1 %1759 }
 0x823   : > { %1701 = vrot.lane.b32.xlu1 %v3283_v39, %s2439_s19 }
 0x825   : > { %v1572_v47 = vpop.permute.xlu0 %1571  ;;  %v1864_v28 = vpop.permute.xlu1 %1863 }
 0x826   : > { %v1579_v21 = vsel %vm642_vm2, %v1564_v3, %v1572_v47  ;;  %v1583_v37 = vsel %vm642_vm2, %v1572_v47, %v1564_v3 }
 0x827   : > { %1869 = vrot.lane.b32.xlu1 %v3283_v39, %s2441_s21  ;;  %v1587_v0 = vmul.f32 %v1583_v37, %v2770_v12  ;;  %v1588_v23 = vmul.f32 %v1579_v21, %v2773_v58 }
 0x829   : > { %v1640_v15 = vpop.permute.xlu0 %1639  ;;  %v1928_v30 = vpop.permute.xlu1 %1927  ;;  %v1615_v47 = vmul.f32 %v3207_v22, %v1587_v0  ;;  %v1616_v37 = vmul.f32 %v3207_v22, %v1588_v23  ;;  %v1823_v22 = vmul.f32 %v3247_v52, %v3865_v51 }
 0x82a   : > { %v1647_v41 = vsel %vm702_vm1, %v1632_v24, %v1640_v15  ;;  %v1651_v18 = vsel %vm702_vm1, %v1640_v15, %v1632_v24 }
 0x82b   : > { %v1655_v14 = vmul.f32 %v1651_v18, %v2754_v62  ;;  %v1656_v50 = vmul.f32 %v1647_v41, %v3864_v60  ;;  %1997 = vrot.lane.b32.xlu1 %v3283_v39, %s2443_s24 }
 0x82d   : > { %v1679_v21 = vmul.f32 %v3209_v9, %v1655_v14  ;;  %v1680_v3 = vmul.f32 %v3209_v9, %v1656_v50  ;;  %v1768_v38 = vpop.permute.xlu0 %1767  ;;  %v1992_v55 = vpop.permute.xlu1 %1991  ;;  %v1824_v9 = vmul.f32 %v3253_v49, %v3866_v46  ;;  %v1847_v49 = vmul.f32 %v3219_v7, %v1823_v22 }
 0x82e   : > { %v1775_v41 = vsel %vm816_vm3, %v1760_v40, %v1768_v38  ;;  %v1779_v15 = vsel %vm816_vm3, %v1768_v38, %v1760_v40 }
 0x82f   : > { %v1687_v6 = vadd.f32 %v1679_v21, %v1615_v47  ;;  %v1688_v17 = vadd.f32 %v1680_v3, %v1616_v37  ;;  %1709 = vrot.lane.b32.xlu1 %v3291_v5, %s2439_s19  ;;  %v1783_v14 = vmul.f32 %v1779_v15, %v2785_v61  ;;  %v1784_v23 = vmul.f32 %v1775_v41, %v2789_v10 }
 0x830   : > { %v1848_v40 = vmul.f32 %v3219_v7, %v1824_v9 }
 0x831   : > { %v1872_v24 = vpop.permute.xlu0 %1871  ;;  %v2056_v18 = vpop.permute.xlu1 %2055  ;;  %v1807_v22 = vmul.f32 %v3241_v54, %v1783_v14  ;;  %v1808_v7 = vmul.f32 %v3241_v54, %v1784_v23 }
 0x832   : > { %v1883_v51 = vsel %vm911_vm6, %v1872_v24, %v1864_v28 }
 0x833   : > { %2061 = vrot.lane.b32.xlu1 %v3283_v39, %s3877_s23  ;;  %v1879_v39 = vsel %vm911_vm6, %v1864_v28, %v1872_v24  ;;  %v1888_v28 = vmul.f32 %v1883_v51, %v2818_v35 }
 0x834   : > { %v1887_v41 = vmul.f32 %v1879_v39, %v2815_v59 }
 0x835   : > { %v2000_v0 = vpop.permute.xlu0 %1999  ;;  %v1704_v50 = vpop.permute.xlu1 %1703 }
 0x836   : > { %v1711_v47 = vsel %vm759_vm4, %v1696_v27, %v1704_v50  ;;  %v1715_v38 = vsel %vm759_vm4, %v1704_v50, %v1696_v27  ;;  %v1911_v51 = vmul.f32 %v3349_v45, %v1887_v41 }
 0x837   : > { %v1719_v46 = vmul.f32 %v1715_v38, %v2792_v8  ;;  %v1720_v52 = vmul.f32 %v1711_v47, %v2795_v31  ;;  %1877 = vrot.lane.b32.xlu1 %v3291_v5, %s2441_s21  ;;  %v2011_v47 = vsel %vm1025_vm7, %v2000_v0, %v1992_v55 }
 0x839   : > { %v1743_v37 = vmul.f32 %v3211_v33, %v1719_v46  ;;  %v1744_v27 = vmul.f32 %v3211_v33, %v1720_v52  ;;  %v2064_v21 = vpop.permute.xlu0 %2063  ;;  %v1936_v3 = vpop.permute.xlu1 %1935  ;;  %v2007_v33 = vsel %vm1025_vm7, %v1992_v55, %v2000_v0  ;;  %v1912_v46 = vmul.f32 %v3349_v45, %v1888_v28  ;;  %v3490_v45 = vld [vmem:[%s3785_s1 + $0x18] ss:$0 sm:$0xff] }
 0x83a   : > { %v1943_v24 = vsel %vm968_vm5, %v1928_v30, %v1936_v3  ;;  %v1947_v15 = vsel %vm968_vm5, %v1936_v3, %v1928_v30  ;;  %v2071_v38 = vsel %vm1082_vm8, %v2056_v18, %v2064_v21  ;;  %v2075_v30 = vsel %vm1082_vm8, %v2064_v21, %v2056_v18  ;;  %v3484_v18 = vld [vmem:[%s3785_s1 + $0x10] ss:$0 sm:$0xff] }
 0x83b   : > { %v1751_v9 = vadd.f32 %v1743_v37, %v1687_v6  ;;  %v1752_v50 = vadd.f32 %v1744_v27, %v1688_v17  ;;  %2005 = vrot.lane.b32.xlu1 %v3291_v5, %s2443_s24  ;;  %v1951_v54 = vmul.f32 %v1943_v24, %v2806_v53  ;;  %v1952_v6 = vmul.f32 %v1947_v15, %v2809_v56  ;;  %s3902_s24 = sshll.u32 %s3906_s30, 4 }
 0x83c   : > { %v2015_v55 = vmul.f32 %v2007_v33, %v2831_v4  ;;  %v2016_v0 = vmul.f32 %v2011_v47, %v2834_v29  ;;  %v2079_v27 = vmul.f32 %v3484_v18, %v2071_v38  ;;  %v2080_v21 = vmul.f32 %v3490_v45, %v2075_v30  ;;  %s467_s16 = scalar_lea.vmem %s3798_s14, %s3902_s24 }
 0x83d   : > { %v1815_v14 = vadd.f32 %v1807_v22, %v1751_v9  ;;  %v1816_v39 = vadd.f32 %v1808_v7, %v1752_v50  ;;  %v1698_v17 = vpop.permute.xlu0 %1697  ;;  %v1566_v23 = vpop.permute.xlu1 %1565 }
 0x83e   : > { %v2039_v24 = vmul.f32 %v3367_v1, %v2015_v55  ;;  %v2040_v15 = vmul.f32 %v3367_v1, %v2016_v0  ;;  %v2103_v9 = vmul.f32 %v3235_v16, %v2079_v27  ;;  %v2104_v50 = vmul.f32 %v3235_v16, %v2080_v21 }
 0x83f   : > { %v1855_v52 = vadd.f32 %v1847_v49, %v1815_v14  ;;  %v1856_v37 = vadd.f32 %v1848_v40, %v1816_v39  ;;  %2069 = vrot.lane.b32.xlu1 %v3291_v5, %s3877_s23  ;;  %v1975_v40 = vmul.f32 %v3227_v42, %v1951_v54  ;;  %v1976_v5 = vmul.f32 %v3227_v42, %v1952_v6 }
 0x841   : > { %v1919_v3 = vadd.f32 %v1911_v51, %v1855_v52  ;;  %v1920_v49 = vadd.f32 %v1912_v46, %v1856_v37  ;;  %v1930_v41 = vpop.permute.xlu0 %1929  ;;  %v1634_v28 = vpop.permute.xlu1 %1633 }
 0x843   : > { %v1983_v22 = vadd.f32 %v1975_v40, %v1919_v3  ;;  %v1984_v7 = vadd.f32 %v1976_v5, %v1920_v49 }
 0x845   : > { %v2047_v33 = vadd.f32 %v2039_v24, %v1983_v22  ;;  %v2048_v47 = vadd.f32 %v2040_v15, %v1984_v7  ;;  %v1706_v38 = vpop.permute.xlu0 %1705  ;;  %v1762_v30 = vpop.permute.xlu1 %1761 }
 0x846   : > { %v1712_v16 = vsel %vm759_vm4, %v1698_v17, %v1706_v38  ;;  %v1716_v55 = vsel %vm759_vm4, %v1706_v38, %v1698_v17 }
 0x847   : > { %v3499_v14 = vadd.f32 %v2103_v9, %v2047_v33  ;;  %v3501_v39 = vadd.f32 %v2104_v50, %v2048_v47  ;;  %v1721_v21 = vmul.f32 %v1716_v55, %v2792_v8  ;;  %v1722_v3 = vmul.f32 %v1712_v16, %v2795_v31 }
 0x849   : > { %v1938_v42 = vpop.permute.xlu0 %1937  ;;  %v1866_v54 = vpop.permute.xlu1 %1865  ;;  %v1745_v7 = vmul.f32 %v3213_v43, %v1721_v21  ;;  %v1746_v9 = vmul.f32 %v3213_v43, %v1722_v3 }
 0x84d   : > { %v3503_v6 = vpop.permute.xlu0 %1867  ;;  %v1994_v51 = vpop.permute.xlu1 %1993 }
 0x851   : > { %v3505_v1 = vpop.permute.xlu0 %1707  ;;  %v3507_v46 = vpop.permute.xlu1 %2057 }
 0x855   : > { %v3513_v0 = vpop.permute.xlu0 %1875  ;;  %v1574_v52 = vpop.permute.xlu1 %1573 }
 0x856   : > { %v1580_v37 = vsel %vm642_vm2, %v1566_v23, %v1574_v52  ;;  %v1584_v27 = vsel %vm642_vm2, %v1574_v52, %v1566_v23  ;;  %v1948_v52 = vsel %vm968_vm5, %v1938_v42, %v1930_v41 }
 0x857   : > { %v1589_v49 = vmul.f32 %v1584_v27, %v2770_v12  ;;  %v1590_v40 = vmul.f32 %v1580_v37, %v2773_v58 }
 0x859   : > { %v3523_v5 = vpop.permute.xlu0 %2003  ;;  %v1642_v17 = vpop.permute.xlu1 %1641  ;;  %v1617_v50 = vmul.f32 %v3221_v2, %v1589_v49  ;;  %v1618_v33 = vmul.f32 %v3221_v2, %v1590_v40 }
 0x85a   : > { %v1648_v24 = vsel %vm702_vm1, %v1634_v28, %v1642_v17  ;;  %v1652_v15 = vsel %vm702_vm1, %v1642_v17, %v1634_v28  ;;  %v1944_v28 = vsel %vm968_vm5, %v1930_v41, %v1938_v42 }
 0x85b   : > { %v1657_v22 = vmul.f32 %v1652_v15, %v2754_v62  ;;  %v1658_v23 = vmul.f32 %v1648_v24, %v3864_v60  ;;  %v1953_v42 = vmul.f32 %v1944_v28, %v2806_v53  ;;  %v1954_v15 = vmul.f32 %v1948_v52, %v2809_v56 }
 0x85d   : > { %v1681_v47 = vmul.f32 %v3229_v32, %v1657_v22  ;;  %v1682_v38 = vmul.f32 %v3229_v32, %v1658_v23  ;;  %v3537_v16 = vpop.permute.xlu0 %1569  ;;  %v1770_v55 = vpop.permute.xlu1 %1769  ;;  %v1977_v52 = vmul.f32 %v3217_v19, %v1953_v42 }
 0x85e   : > { %v1776_v43 = vsel %vm816_vm3, %v1762_v30, %v1770_v55  ;;  %v1780_v37 = vsel %vm816_vm3, %v1770_v55, %v1762_v30 }
 0x85f   : > { %v1689_v2 = vadd.f32 %v1681_v47, %v1617_v50  ;;  %v1690_v27 = vadd.f32 %v1682_v38, %v1618_v33  ;;  %v1785_v21 = vmul.f32 %v1780_v37, %v2785_v61  ;;  %v1786_v32 = vmul.f32 %v1776_v43, %v2789_v10 }
 0x861   : > { %v1753_v3 = vadd.f32 %v1745_v7, %v1689_v2  ;;  %v1754_v49 = vadd.f32 %v1746_v9, %v1690_v27  ;;  %v1809_v40 = vmul.f32 %v3215_v44, %v1785_v21  ;;  %v1810_v17 = vmul.f32 %v3215_v44, %v1786_v32  ;;  %v3551_v24 = vpop.permute.xlu0 %1637  ;;  %v1874_v41 = vpop.permute.xlu1 %1873 }
 0x862   : > { %v1880_v30 = vsel %vm911_vm6, %v1866_v54, %v1874_v41  ;;  %v1884_v22 = vsel %vm911_vm6, %v1874_v41, %v1866_v54  ;;  %v1978_v54 = vmul.f32 %v3217_v19, %v1954_v15 }
 0x863   : > { %v1817_v23 = vadd.f32 %v1809_v40, %v1753_v3  ;;  %v1818_v7 = vadd.f32 %v1810_v17, %v1754_v49  ;;  %v1889_v9 = vmul.f32 %v1880_v30, %v2815_v59  ;;  %v1890_v50 = vmul.f32 %v1884_v22, %v2818_v35 }
 0x865   : > { %v1857_v44 = vadd.f32 %v3263_v26, %v1817_v23  ;;  %v1858_v33 = vadd.f32 %v3267_v11, %v1818_v7  ;;  %v1913_v47 = vmul.f32 %v3223_v34, %v1889_v9  ;;  %v1914_v38 = vmul.f32 %v3223_v34, %v1890_v50  ;;  %v3565_v55 = vpop.permute.xlu0 %1765  ;;  %v2002_v28 = vpop.permute.xlu1 %2001 }
 0x866   : > { %v2008_v43 = vsel %vm1025_vm7, %v1994_v51, %v2002_v28  ;;  %v2012_v37 = vsel %vm1025_vm7, %v2002_v28, %v1994_v51 }
 0x867   : > { %v1921_v26 = vadd.f32 %v1913_v47, %v1857_v44  ;;  %v1922_v2 = vadd.f32 %v1914_v38, %v1858_v33  ;;  %v2017_v11 = vmul.f32 %v2008_v43, %v2831_v4  ;;  %v2018_v27 = vmul.f32 %v2012_v37, %v2834_v29 }
 0x869   : > { %v1985_v34 = vadd.f32 %v1977_v52, %v1921_v26  ;;  %v1986_v21 = vadd.f32 %v1978_v54, %v1922_v2  ;;  %v2041_v32 = vmul.f32 %v3231_v20, %v2017_v11  ;;  %v2042_v3 = vmul.f32 %v3231_v20, %v2018_v27  ;;  %v3577_v49 = vpop.permute.xlu0 %1933  ;;  %v2066_v19 = vpop.permute.xlu1 %2065 }
 0x86a   : > { %v2072_v40 = vsel %vm1082_vm8, %v3507_v46, %v2066_v19  ;;  %v2076_v51 = vsel %vm1082_vm8, %v2066_v19, %v3507_v46  ;;  %v2123_v54 = vmul.f32 0.70710677, %v3499_v14  ;;  %v2124_v26 = vmul.f32 0.70710677, %v3501_v39 }
 0x86b   : > { %v2049_v17 = vadd.f32 %v2041_v32, %v1985_v34  ;;  %v2050_v41 = vadd.f32 %v2042_v3, %v1986_v21  ;;  %v2081_v42 = vmul.f32 %v3484_v18, %v2072_v40  ;;  %v2082_v15 = vmul.f32 %v3490_v45, %v2076_v51 }
 0x86c   : > { %2407 = verf.f32 %v2123_v54 }
 0x86d   : > { %v2105_v30 = vmul.f32 %v3387_v25, %v2081_v42  ;;  %v2106_v20 = vmul.f32 %v3387_v25, %v2082_v15  ;;  %v1568_v22 = vpop.permute.xlu1 %1567  ;;  %v3593_v9 = vpop.permute.xlu0 %1577  ;;  %2409 = verf.f32 %v2124_v26  ;;  %v1885_v42 = vsel %vm911_vm6, %v3513_v0, %v3503_v6 }
 0x86f   : > { %v3589_v23 = vadd.f32 %v2105_v30, %v2049_v17  ;;  %v3591_v7 = vadd.f32 %v2106_v20, %v2050_v41  ;;  %v1881_v41 = vsel %vm911_vm6, %v3503_v6, %v3513_v0 }
 0x871   : > { %v1636_v50 = vpop.permute.xlu1 %1635  ;;  %v3595_v44 = vpop.permute.xlu0 %1645 }
 0x875   : > { %v1700_v46 = vpop.permute.xlu1 %1699  ;;  %v3597_v47 = vpop.permute.xlu0 %1773 }
 0x876   : > { %v1713_v2 = vsel %vm759_vm4, %v1700_v46, %v3505_v1  ;;  %v1717_v11 = vsel %vm759_vm4, %v3505_v1, %v1700_v46 }
 0x877   : > { %v1723_v3 = vmul.f32 %v1717_v11, %v2792_v8  ;;  %v1724_v19 = vmul.f32 %v1713_v2, %v2795_v31  ;;  %v1891_v2 = vmul.f32 %v1881_v41, %v2815_v59 }
 0x879   : > { %v1764_v33 = vpop.permute.xlu1 %1763  ;;  %v2060_v28 = vpop.permute.xlu0 %2059  ;;  %v1747_v54 = vmul.f32 %v3237_v63, %v1723_v3 }
 0x87d   : > { %v1932_v38 = vpop.permute.xlu1 %1931  ;;  %v3611_v27 = vpop.permute.xlu0 %1941 }
 0x881   : > { %v1996_v52 = vpop.permute.xlu1 %1995  ;;  %v2068_v15 = vpop.permute.xlu0 %2067 }
 0x882   : > { %v2073_v11 = vsel %vm1082_vm8, %v2060_v28, %v2068_v15 }
 0x885   : > { %v1576_v25 = vpop.permute.xlu1 %1575 }
 0x886   : > { %v1581_v43 = vsel %vm642_vm2, %v1568_v22, %v1576_v25  ;;  %v1585_v37 = vsel %vm642_vm2, %v1576_v25, %v1568_v22  ;;  %v1748_v25 = vmul.f32 %v3237_v63, %v1724_v19  ;;  %v2077_v63 = vsel %vm1082_vm8, %v2068_v15, %v2060_v28  ;;  %v3886_v15 = vld [vmem:[#allocation13_spill] sm:$0xff] }
 0x887   : > { %v1591_v34 = vmul.f32 %v1585_v37, %v2770_v12  ;;  %v1592_v21 = vmul.f32 %v1581_v43, %v2773_v58  ;;  %v2009_v19 = vsel %vm1025_vm7, %v1996_v52, %v3523_v5 }
 0x889   : > { %v1644_v32 = vpop.permute.xlu1 %1643  ;;  %v1619_v30 = vmul.f32 %v3225_v36, %v1591_v34  ;;  %v1620_v20 = vmul.f32 %v3225_v36, %v1592_v21 }
 0x88a   : > { %v1649_v40 = vsel %vm702_vm1, %v1636_v50, %v1644_v32  ;;  %v1653_v51 = vsel %vm702_vm1, %v1644_v32, %v1636_v50 }
 0x88b   : > { %v1659_v1 = vmul.f32 %v1653_v51, %v2754_v62  ;;  %v1660_v17 = vmul.f32 %v1649_v40, %v3864_v60  ;;  %v2013_v40 = vsel %vm1025_vm7, %v3523_v5, %v1996_v52  ;;  %v2019_v5 = vmul.f32 %v2009_v19, %v2831_v4 }
 0x88c   : > { %v2020_v52 = vmul.f32 %v2013_v40, %v2834_v29 }
 0x88d   : > { %v1683_v22 = vmul.f32 %v3243_v48, %v1659_v1  ;;  %v1684_v50 = vmul.f32 %v3243_v48, %v1660_v17  ;;  %v1772_v46 = vpop.permute.xlu1 %1771  ;;  %v1892_v48 = vmul.f32 %v1885_v42, %v2818_v35  ;;  %v2408_v1 = vpop.eup %2407 }
 0x88e   : > { %v1777_v43 = vsel %vm816_vm3, %v1764_v33, %v1772_v46  ;;  %v1781_v6 = vsel %vm816_vm3, %v1772_v46, %v1764_v33 }
 0x88f   : > { %v1691_v0 = vadd.f32 %v1683_v22, %v1619_v30  ;;  %v1692_v37 = vadd.f32 %v1684_v50, %v1620_v20  ;;  %v1787_v26 = vmul.f32 %v1781_v6, %v2785_v61  ;;  %v1788_v36 = vmul.f32 %v1777_v43, %v2789_v10  ;;  %v2410_v22 = vpop.eup %2409  ;;  %v3887_v50 = vld [vmem:[#allocation8_spill] sm:$0xff] }
 0x890   : > { %v1915_v30 = vmul.f32 %v3886_v15, %v1891_v2  ;;  %v1916_v20 = vmul.f32 %v3886_v15, %v1892_v48  ;;  %v2083_v43 = vmul.f32 %v3484_v18, %v2073_v11  ;;  %v2084_v6 = vmul.f32 %v3490_v45, %v2077_v63 }
 0x891   : > { %v1755_v34 = vadd.f32 %v1747_v54, %v1691_v0  ;;  %v1756_v21 = vadd.f32 %v1748_v25, %v1692_v37  ;;  %v1811_v33 = vmul.f32 %v3265_v13, %v1787_v26  ;;  %v1812_v32 = vmul.f32 %v3265_v13, %v1788_v36  ;;  %v1940_v3 = vpop.permute.xlu1 %1939  ;;  %v3888_v54 = vld [vmem:[#allocation9_spill] sm:$0xff]  ;;  %v3889_v26 = vld [vmem:[#allocation14_spill] sm:$0xff] }
 0x892   : > { %v1945_v51 = vsel %vm968_vm5, %v1932_v38, %v1940_v3  ;;  %v1949_v28 = vsel %vm968_vm5, %v1940_v3, %v1932_v38  ;;  %v2119_v48 = vmul.f32 0.5, %v3499_v14  ;;  %v1582_v63 = vsel %vm642_vm2, %v3537_v16, %v3593_v9 }
 0x893   : > { %v1819_v17 = vadd.f32 %v1811_v33, %v1755_v34  ;;  %v1820_v41 = vadd.f32 %v1812_v32, %v1756_v21  ;;  %v1955_v13 = vmul.f32 %v1945_v51, %v2806_v53  ;;  %v1956_v42 = vmul.f32 %v1949_v28, %v2809_v56  ;;  %v3890_v32 = vld [vmem:[#allocation15_spill] sm:$0xff] }
 0x894   : > { %v2120_v34 = vmul.f32 0.5, %v3501_v39  ;;  %v2132_v21 = vadd.f32 1.0, %v2410_v22  ;;  %v2131_v33 = vadd.f32 1.0, %v2408_v1  ;;  %v2043_v3 = vmul.f32 %v3890_v32, %v2019_v5  ;;  %v3891_v1 = vld [vmem:[#allocation19_spill] sm:$0xff] }
 0x895   : > { %v1859_v46 = vadd.f32 %v3887_v50, %v1819_v17  ;;  %v1860_v38 = vadd.f32 %v3888_v54, %v1820_v41  ;;  %v1702_v25 = vpop.permute.xlu1 %1701  ;;  %v1979_v36 = vmul.f32 %v3889_v26, %v1955_v13  ;;  %v1980_v2 = vmul.f32 %v3889_v26, %v1956_v42  ;;  %v3892_v54 = vld [vmem:[#allocation3_spill] sm:$0xff] }
 0x896   : > { %v2044_v19 = vmul.f32 %v3890_v32, %v2020_v52  ;;  %v1586_v14 = vsel %vm642_vm2, %v3593_v9, %v3537_v16  ;;  %v1650_v39 = vsel %vm702_vm1, %v3551_v24, %v3595_v44  ;;  %v1654_v28 = vsel %vm702_vm1, %v3595_v44, %v3551_v24 }
 0x897   : > { %v1923_v0 = vadd.f32 %v1915_v30, %v1859_v46  ;;  %v1924_v37 = vadd.f32 %v1916_v20, %v1860_v38  ;;  %v2107_v17 = vmul.f32 %v3891_v1, %v2083_v43  ;;  %v2108_v41 = vmul.f32 %v3891_v1, %v2084_v6 }
 0x898   : > { %v2136_v15 = vmul.f32 %v2132_v21, %v2120_v34  ;;  %v2135_v30 = vmul.f32 %v2131_v33, %v2119_v48  ;;  %v1661_v16 = vmul.f32 %v1654_v28, %v2754_v62  ;;  %v1662_v9 = vmul.f32 %v1650_v39, %v3864_v60 }
 0x899   : > { %v1987_v40 = vadd.f32 %v1979_v36, %v1923_v0  ;;  %v1988_v11 = vadd.f32 %v1980_v2, %v1924_v37  ;;  %v1870_v51 = vpop.permute.xlu1 %1869  ;;  %v1593_v52 = vmul.f32 %v1586_v14, %v2770_v12  ;;  %v1594_v50 = vmul.f32 %v1582_v63, %v2773_v58  ;;  %v3893_v37 = vld [vmem:[#allocation7_spill] sm:$0xff] }
 0x89a   : > { %v1778_v24 = vsel %vm816_vm3, %v3565_v55, %v3597_v47  ;;  %v1782_v44 = vsel %vm816_vm3, %v3597_v47, %v3565_v55  ;;  %v2125_v46 = vmul.f32 0.70710677, %v3589_v23  ;;  %v2126_v12 = vmul.f32 0.70710677, %v3591_v7 }
 0x89b   : > { %v2051_v13 = vadd.f32 %v2043_v3, %v1987_v40  ;;  %v2052_v42 = vadd.f32 %v2044_v19, %v1988_v11  ;;  %v1685_v58 = vmul.f32 %v3892_v54, %v1661_v16  ;;  %v1686_v38 = vmul.f32 %v3892_v54, %v1662_v9  ;;  %v3895_v3 = vld [vmem:[#allocation5_spill] sm:$0xff]  ;;  %v3898_v16 = vld [vmem:[#allocation12_spill] sm:$0xff] }
 0x89c   : > { %v1789_v6 = vmul.f32 %v1782_v44, %v2785_v61  ;;  %v1790_v0 = vmul.f32 %v1778_v24, %v2789_v10  ;;  %v1621_v26 = vmul.f32 %v3893_v37, %v1593_v52  ;;  %v1622_v36 = vmul.f32 %v3893_v37, %v1594_v50  ;;  %v3894_v61 = vld [vmem:[#allocation6_spill] sm:$0xff] }
 0x89d   : > { %v2115_v20 = vadd.f32 %v2107_v17, %v2051_v13  ;;  %v1998_v22 = vpop.permute.xlu1 %1997  ;;  %v2116_v5 = vadd.f32 %v2108_v41, %v2052_v42  ;;  %2411 = verf.f32 %v2125_v46 }
 0x89e   : > { %v1693_v34 = vadd.f32 %v1685_v58, %v1621_v26  ;;  %v1694_v21 = vadd.f32 %v1686_v38, %v1622_v36  ;;  %2413 = verf.f32 %v2126_v12  ;;  %v1813_v19 = vmul.f32 %v3895_v3, %v1789_v6  ;;  %v3900_v38 = vld [vmem:[#allocation17_spill] sm:$0xff] }
 0x89f   : > { %v3707_v62 = vmul.f32 %v2136_v15, %v2116_v5  ;;  %v3709_v60 = vmul.f32 %v2135_v30, %v2115_v20  ;;  %v3897_v15 = vld [vmem:[#allocation11_spill] sm:$0xff]  ;;  %v3899_v5 = vld [vmem:[#allocation16_spill] sm:$0xff]  ;;  %v2121_v26 = vmul.f32 0.5, %v3589_v23  ;;  %v2122_v36 = vmul.f32 0.5, %v3591_v7  ;;  %v2143_v23 = vld [vmem:[%s3797_s13] sm:$0xff] }
 0x8a1   : > { %v1710_v43 = vpop.permute.xlu1 %1709 }
 0x8a2   : > { %v1714_v55 = vsel %vm759_vm4, %v1702_v25, %v1710_v43  ;;  %v1718_v47 = vsel %vm759_vm4, %v1710_v43, %v1702_v25  ;;  %v1814_v25 = vmul.f32 %v3895_v3, %v1790_v0 }
 0x8a3   : > { %v1725_v2 = vmul.f32 %v1718_v47, %v2792_v8  ;;  %v1726_v48 = vmul.f32 %v1714_v55, %v2795_v31  ;;  %v1946_v8 = vsel %vm968_vm5, %v3577_v49, %v3611_v27  ;;  %v1950_v31 = vsel %vm968_vm5, %v3611_v27, %v3577_v49  ;;  %v3896_v49 = vld [vmem:[#allocation10_spill] sm:$0xff] }
 0x8a4   : > { %v1957_v28 = vmul.f32 %v1946_v8, %v2806_v53  ;;  %v1958_v1 = vmul.f32 %v1950_v31, %v2809_v56 }
 0x8a5   : > { %v1749_v33 = vmul.f32 %v3894_v61, %v1725_v2  ;;  %v1750_v10 = vmul.f32 %v3894_v61, %v1726_v48  ;;  %v2062_v32 = vpop.permute.xlu1 %2061 }
 0x8a6   : > { %v1981_v52 = vmul.f32 %v3899_v5, %v1957_v28  ;;  %v1982_v50 = vmul.f32 %v3899_v5, %v1958_v1 }
 0x8a7   : > { %v1757_v40 = vadd.f32 %v1749_v33, %v1693_v34  ;;  %v1758_v11 = vadd.f32 %v1750_v10, %v1694_v21  ;;  %v2412_v56 = vpop.eup %2411  ;;  %v3901_v34 = vld [vmem:[#allocation18_spill] sm:$0xff] }
 0x8a8   : > { %v2414_v12 = vpop.eup %2413  ;;  %v2133_v47 = vadd.f32 1.0, %v2412_v56 }
 0x8a9   : > { %v1821_v63 = vadd.f32 %v1813_v19, %v1757_v40  ;;  %v1822_v14 = vadd.f32 %v1814_v25, %v1758_v11  ;;  %v1878_v39 = vpop.permute.xlu1 %1877  ;;  %v3903_v25 = vld [vmem:[#allocation2_spill] sm:$0xff] }
 0x8aa   : > { %v1882_v17 = vsel %vm911_vm6, %v1870_v51, %v1878_v39  ;;  %v1886_v41 = vsel %vm911_vm6, %v1878_v39, %v1870_v51  ;;  %v2137_v33 = vmul.f32 %v2133_v47, %v2121_v26 }
 0x8ab   : > { %v1893_v13 = vmul.f32 %v1882_v17, %v2815_v59  ;;  %v1894_v42 = vmul.f32 %v1886_v41, %v2818_v35  ;;  %v1861_v27 = vadd.f32 %v3896_v49, %v1821_v63  ;;  %v1862_v30 = vadd.f32 %v3897_v15, %v1822_v14 }
 0x8ad   : > { %v1917_v9 = vmul.f32 %v3898_v16, %v1893_v13  ;;  %v1918_v53 = vmul.f32 %v3898_v16, %v1894_v42  ;;  %v2006_v20 = vpop.permute.xlu1 %2005 }
 0x8ae   : > { %v2010_v51 = vsel %vm1025_vm7, %v1998_v22, %v2006_v20  ;;  %v2014_v59 = vsel %vm1025_vm7, %v2006_v20, %v1998_v22 }
 0x8af   : > { %v1925_v35 = vadd.f32 %v1917_v9, %v1861_v27  ;;  %v1926_v24 = vadd.f32 %v1918_v53, %v1862_v30  ;;  %v2021_v44 = vmul.f32 %v2010_v51, %v2831_v4  ;;  %v2022_v46 = vmul.f32 %v2014_v59, %v2834_v29 }
 0x8b0   : > { %v2134_v29 = vadd.f32 1.0, %v2414_v12 }
 0x8b1   : > { %v1989_v54 = vadd.f32 %v1981_v52, %v1925_v35  ;;  %v1990_v58 = vadd.f32 %v1982_v50, %v1926_v24  ;;  %v2045_v43 = vmul.f32 %v3900_v38, %v2021_v44  ;;  %v2046_v6 = vmul.f32 %v3900_v38, %v2022_v46  ;;  %v2070_v0 = vpop.permute.xlu1 %2069 }
 0x8b2   : > { %v2074_v55 = vsel %vm1082_vm8, %v2062_v32, %v2070_v0  ;;  %v2078_v22 = vsel %vm1082_vm8, %v2070_v0, %v2062_v32  ;;  %v2138_v32 = vmul.f32 %v2134_v29, %v2122_v36 }
 0x8b3   : > { %v2085_v37 = vmul.f32 %v3484_v18, %v2074_v55  ;;  %v2086_v4 = vmul.f32 %v3490_v45, %v2078_v22  ;;  %v2053_v2 = vadd.f32 %v2045_v43, %v1989_v54  ;;  %v2054_v48 = vadd.f32 %v2046_v6, %v1990_v58 }
 0x8b5   : > { %v2109_v21 = vmul.f32 %v3901_v34, %v2085_v37  ;;  %v2110_v61 = vmul.f32 %v3901_v34, %v2086_v4 }
 0x8b7   : > { %v2117_v57 = vadd.f32 %v2109_v21, %v2053_v2  ;;  %v2118_v10 = vadd.f32 %v2110_v61, %v2054_v48 }
 0x8b9   : > { %v2141_v3 = vmul.f32 %v2137_v33, %v2117_v57  ;;  %v2142_v18 = vmul.f32 %v2138_v32, %v2118_v10 }
 0x8bb   : > { %v2303_v45 = vpack.c.bf16 %v2142_v18, %v3707_v62  ;;  %v2305_v19 = vpack.c.bf16 %v2141_v3, %v3709_v60  ;;  %v3904_v62 = vld [vmem:[#allocation4_spill] sm:$0xff] }
 0x8bd   : > { %2304 = vmatprep.subr.bf16.mxu1 %v2303_v45 }
 0x8be   : > { %2306 = vmatpush1.bf16.msra.mxu1 %v2305_v19 }
 0x8c1   : > { %2298 = vmatmul.mubr.msk.f32.vlgmr.msra.gmra.mrb[10].mxu1 %vm2144_vm13, %v2143_v23 }
 0x994   : > { %v2214_v7 = vpop.f32.mrb[10].mxu1 }
 0x995   : > { %v2219_v8 = vadd.f32 %v2214_v7, %v3903_v25  ;;  %v2216_v31 = vpop.f32.mrb[11].mxu1 }
 0x996   : > { %v2220_v40 = vadd.f32 %v2216_v31, %v3904_v62 }
 0x997   : > { %2221 = vst [vmem:[%s467_s16] sm:$0xff] %v2219_v8 }
 0x998   : > { %2222 = vst [vmem:[%s467_s16 + $0x8] sm:$0xff] %v2220_v40 }
 0x999 PF: > { %s24_s29 = sadd.s32 1, %s2425_s29  }
 0x99a   : > { %p21_p4 = scmp.ge.s32.totalorder %s24_s29, 4  }
 0x99c   :  { %23 = sbr.rel (!%p21_p4) target bundleno = 1 (0x1), region = 106 }

</bundles_post_ra>
